<compile_context>
chip_gen: v7x
topology: tpu7x:2x2x1
jax: 0.10.0
libtpu: 0.0.40
codegen_flags: <defaults>
</compile_context>

<pallas_src>
import jax
import jax.numpy as jnp
from jax import lax
from jax.experimental import pallas as pl
from jax.experimental.pallas import tpu as pltpu

# --- module constants (from the PyTorch source) ---
BLOCK_SIZE = 256
HEAD_SIZE = 64
NUM_HEADS = 6
N_EMBD = NUM_HEADS * HEAD_SIZE   # 384
SCALE = HEAD_SIZE ** -0.5
MASK_VALUE = -1e30               # finite: avoids exp(-inf - (-inf)) = NaN on padded rows


# ---------------- Pallas kernel ----------------

def _mha_fused_kernel(x_ref, wqkv_ref, wproj_ref, b_ref, o_ref, cat_ref):
    """B_BLK batch rows: fused QKV projection + 6-head causal attention + output projection."""
    b_blk, T, C = x_ref.shape
    M = b_blk * T

    # Fold batch into the MXU M dimension: (B_BLK*T, C) @ (C, 3C) in one pass.
    x = x_ref[...].reshape(M, C).astype(jnp.bfloat16)
    qkv = jnp.dot(x, wqkv_ref[...],
                  preferred_element_type=jnp.float32)            # (M, 3C) f32 accum
    # (SCALE is already folded into the Q columns of wqkv by the wrapper.)

    rows = lax.broadcasted_iota(jnp.int32, (T, T), 0)
    cols = lax.broadcasted_iota(jnp.int32, (T, T), 1)
    causal = cols <= rows                                         # tril mask, hoisted

    # Static unroll over heads x batch rows; each head's output is written
    # directly into the VMEM "concat" scratch so nothing stays live past its use.
    for h in range(NUM_HEADS):
        q_sl = slice(h * HEAD_SIZE, (h + 1) * HEAD_SIZE)
        k_sl = slice(C + h * HEAD_SIZE, C + (h + 1) * HEAD_SIZE)
        v_sl = slice(2 * C + h * HEAD_SIZE, 2 * C + (h + 1) * HEAD_SIZE)
        for b in range(b_blk):
            r = slice(b * T, (b + 1) * T)
            qh = qkv[r, q_sl].astype(jnp.bfloat16)                # (T, 64), pre-scaled
            kh = qkv[r, k_sl].astype(jnp.bfloat16)
            vh = qkv[r, v_sl].astype(jnp.bfloat16)
            # s = q @ k^T : contract the head dim of both operands (no transpose).
            s = lax.dot_general(qh, kh, (((1,), (1,)), ((), ())),
                                preferred_element_type=jnp.float32)   # (T, T) f32
            s = jnp.where(causal, s, MASK_VALUE)
            m = jnp.max(s, axis=-1, keepdims=True)
            p = jnp.exp(s - m)
            l = jnp.sum(p, axis=-1, keepdims=True)
            # Unnormalized PV matmul; normalize the small (T, 64) result in f32
            # afterwards (EUP reciprocal -> frees VPU cycles, 4x fewer vmuls).
            oh = jnp.dot(p.astype(jnp.bfloat16), vh,
                         preferred_element_type=jnp.float32)          # (T, 64) f32
            oh = oh * pl.reciprocal(l, approx=True)
            cat_ref[r, q_sl] = oh.astype(cat_ref.dtype)

    # Output projection fused into the same kernel: (M, C) @ (C, C) + b.
    proj = jnp.dot(cat_ref[...], wproj_ref[...],
                   preferred_element_type=jnp.float32)
    o_ref[...] = (proj + b_ref[...]).reshape(b_blk, T, C).astype(o_ref.dtype)
    # Dropout (attention weights + projection output): identity in eval mode.


# ---------------- wrapper ----------------

def _pick_b_blk(B, T):
    """How many batch rows one grid step processes (M = b_blk * T MXU rows)."""
    # Target ~512 MXU rows per step to amortize the ~0.35 us per-step overhead
    # and fill the 128/256-row MXU; cap the static unroll (NUM_HEADS * b_blk);
    # keep grid >= 2 whenever B >= 2 so both v7x TensorCores get work.
    target_rows = 512
    b_blk = max(1, min(B, target_rows // max(T, 1), 8))
    while b_blk > 1 and (B + b_blk - 1) // b_blk < 2:
        b_blk //= 2
    while B % b_blk != 0:        # keep the grid exact (no ragged last step)
        b_blk -= 1
    return b_blk


def multi_head_attention(x, wq, wk, wv, w_proj, b_proj):
    """
    x:        (B, T, C)                   float32
    wq/wk/wv: (NUM_HEADS, C, HEAD_SIZE)   (already transposed: y = x @ w)
    w_proj:   (C, C)                      (transposed torch weight: y = x @ w_proj + b)
    b_proj:   (C,)
    returns   (B, T, C)
    """
    B, T, C = x.shape
    assert C == N_EMBD and T <= BLOCK_SIZE

    # One-time parameter prep (weight-loading cost, outside the kernel):
    # fuse the per-head q/k/v weights into a single (C, 3C) matrix so that
    # (x @ w_qkv)[:, h*D:(h+1)*D] == x @ wq[h], etc.  The attention SCALE is
    # folded into the Q columns here, eliminating the per-head (T,T) multiply.
    def _headcat(w):                                            # (H, C, D) -> (C, H*D)
        return jnp.transpose(w, (1, 0, 2)).reshape(C, NUM_HEADS * HEAD_SIZE)

    w_qkv = jnp.concatenate(
        [_headcat(wq) * SCALE, _headcat(wk), _headcat(wv)], axis=-1
    ).astype(jnp.bfloat16)                                      # (C, 3C) = (384, 1152)
    w_proj_bf = w_proj.astype(jnp.bfloat16)                     # (C, C)
    bias = b_proj.reshape(1, C).astype(jnp.float32)

    b_blk = _pick_b_blk(B, T)
    M = b_blk * T
    grid = (B // b_blk,)
    # Per-step VMEM footprint (x/out double-buffered + f32 qkv + bf16 concat +
    # weights) stays well under 16 MiB for M <= 512, so the default scoped
    # VMEM limit is fine on v5e/v6e/v7x; no vmem_limit_bytes override needed.

    return pl.pallas_call(
        _mha_fused_kernel,
        out_shape=jax.ShapeDtypeStruct((B, T, C), x.dtype),
        grid_spec=pltpu.PrefetchScalarGridSpec(
            num_scalar_prefetch=0,
            grid=grid,
            in_specs=[
                pl.BlockSpec((b_blk, T, C), lambda i: (i, 0, 0)),   # x, b_blk batch rows per step
                pl.BlockSpec((C, 3 * C), lambda i: (0, 0)),         # fused QKV weight (resident)
                pl.BlockSpec((C, C), lambda i: (0, 0)),             # projection weight (resident)
                pl.BlockSpec((1, C), lambda i: (0, 0)),             # projection bias (resident)
            ],
            out_specs=pl.BlockSpec((b_blk, T, C), lambda i: (i, 0, 0)),
            scratch_shapes=[pltpu.VMEM((M, C), jnp.bfloat16)],       # "concat" buffer
        ),
        compiler_params=pltpu.CompilerParams(
            dimension_semantics=("parallel",)),
    )(x, w_qkv, w_proj_bf, bias)


def _reference(x, wq, wk, wv, w_proj, b_proj):
    """Plain-JAX float32 reference mirroring the PyTorch forward (eval mode)."""
    B, T, C = x.shape
    outs = []
    for h in range(NUM_HEADS):
        q = x @ wq[h]
        k = x @ wk[h]
        v = x @ wv[h]
        wei = (q @ jnp.swapaxes(k, -2, -1)) * SCALE
        mask = jnp.tril(jnp.ones((T, T), dtype=bool))
        wei = jnp.where(mask, wei, -jnp.inf)
        wei = jax.nn.softmax(wei, axis=-1)
        outs.append(wei @ v)
    cat = jnp.concatenate(outs, axis=-1)
    return cat @ w_proj + b_proj


def _run_case(key, B, T):
    kx, kq, kk, kv, kw, kb = jax.random.split(key, 6)
    x = jax.random.normal(kx, (B, T, N_EMBD), dtype=jnp.float32)

    init = 0.02   # nn.Linear-like scale
    wq = init * jax.random.normal(kq, (NUM_HEADS, N_EMBD, HEAD_SIZE), dtype=jnp.float32)
    wk = init * jax.random.normal(kk, (NUM_HEADS, N_EMBD, HEAD_SIZE), dtype=jnp.float32)
    wv = init * jax.random.normal(kv, (NUM_HEADS, N_EMBD, HEAD_SIZE), dtype=jnp.float32)
    w_proj = init * jax.random.normal(kw, (N_EMBD, N_EMBD), dtype=jnp.float32)
    b_proj = init * jax.random.normal(kb, (N_EMBD,), dtype=jnp.float32)

    out = multi_head_attention(x, wq, wk, wv, w_proj, b_proj)
    out = jax.block_until_ready(out)

    ref = _reference(x, wq, wk, wv, w_proj, b_proj)
    assert out.shape == (B, T, N_EMBD)
    # Tolerance accounts for bf16 MXU operands (f32 accumulation) + approx reciprocal.
    assert jnp.allclose(out, ref, atol=2e-2, rtol=2e-2), (
        f"mismatch vs reference (B={B}, T={T}), "
        f"max abs diff = {jnp.max(jnp.abs(out - ref))}")


if __name__ == "__main__":
    key = jax.random.PRNGKey(0)
    k1, k2 = jax.random.split(key, 2)

    # Small case (B_BLK=1, grid=(2,)) — matches the spec's tiny-shape requirement.
    _run_case(k1, B=2, T=8)
    # Slightly larger case exercising the batch-folding path (B_BLK=2, grid=(2,)).
    _run_case(k2, B=4, T=64)

    print("KERNEL_OK")
</pallas_src>

<mosaic_0001>
module attributes {stable_mosaic.version = 11 : i64} {
  func.func @_mha_fused_kernel(%arg0: i32, %arg1: memref<1x8x384xf32, #tpu.memory_space<vmem>>, %arg2: memref<384x1152xbf16, #tpu.memory_space<vmem>>, %arg3: memref<384x384xbf16, #tpu.memory_space<vmem>>, %arg4: memref<1x384xf32, #tpu.memory_space<vmem>>, %arg5: memref<1x8x384xf32, #tpu.memory_space<vmem>>, %arg6: memref<8x384xbf16, #tpu.memory_space<vmem>>) attributes {dimension_semantics = [#tpu.dimension_semantics<parallel>], iteration_bounds = array<i64: 2>, scalar_prefetch = 0 : i64, scratch_operands = 1 : i64, tpu.core_type = #tpu.core_type<tc>, window_params = [{transform_indices = @transform_0, window_bounds = array<i64: 1, 8, 384>}, {pipeline_mode = #tpu.pipeline_mode<synchronous>, transform_indices = @transform_1, window_bounds = array<i64: 384, 1152>}, {pipeline_mode = #tpu.pipeline_mode<synchronous>, transform_indices = @transform_2, window_bounds = array<i64: 384, 384>}, {pipeline_mode = #tpu.pipeline_mode<synchronous>, transform_indices = @transform_3, window_bounds = array<i64: 1, 384>}, {transform_indices = @transform_4, window_bounds = array<i64: 1, 8, 384>}]} {
    %c0 = arith.constant 0 : index
    %c0_0 = arith.constant 0 : index
    %c0_1 = arith.constant 0 : index
    %0 = vector.load %arg1[%c0, %c0_0, %c0_1] : memref<1x8x384xf32, #tpu.memory_space<vmem>>, vector<1x8x384xf32>
    %1 = vector.shape_cast %0 : vector<1x8x384xf32> to vector<8x384xf32>
    %2 = arith.truncf %1 : vector<8x384xf32> to vector<8x384xbf16>
    %c0_2 = arith.constant 0 : index
    %c0_3 = arith.constant 0 : index
    %3 = vector.load %arg2[%c0_2, %c0_3] : memref<384x1152xbf16, #tpu.memory_space<vmem>>, vector<384x1152xbf16>
    %cst = arith.constant dense<0.000000e+00> : vector<8x1152xf32>
    %4 = tpu.matmul %2, %3, %cst {dimension_numbers = #tpu.dot_dimension_numbers<[1], [0], [0], [1], [0, 0, 1, 1], [], []>} : vector<8x384xbf16>, vector<384x1152xbf16>, vector<8x1152xf32> -> vector<8x1152xf32>
    %5 = tpu.iota {dimensions = array<i32: 0>} : vector<8x8xi32>
    %6 = tpu.iota {dimensions = array<i32: 1>} : vector<8x8xi32>
    %7 = arith.cmpi sle, %6, %5 : vector<8x8xi32>
    %8 = vector.extract_strided_slice %4 {offsets = [0, 0], sizes = [8, 64], strides = [1, 1]} : vector<8x1152xf32> to vector<8x64xf32>
    %9 = arith.truncf %8 : vector<8x64xf32> to vector<8x64xbf16>
    %10 = vector.extract_strided_slice %4 {offsets = [0, 384], sizes = [8, 64], strides = [1, 1]} : vector<8x1152xf32> to vector<8x64xf32>
    %11 = arith.truncf %10 : vector<8x64xf32> to vector<8x64xbf16>
    %12 = vector.extract_strided_slice %4 {offsets = [0, 768], sizes = [8, 64], strides = [1, 1]} : vector<8x1152xf32> to vector<8x64xf32>
    %13 = arith.truncf %12 : vector<8x64xf32> to vector<8x64xbf16>
    %cst_4 = arith.constant dense<0.000000e+00> : vector<8x8xf32>
    %14 = tpu.matmul %9, %11, %cst_4 {dimension_numbers = #tpu.dot_dimension_numbers<[1], [1], [0], [0], [0, 0, 1, 0], [], []>} : vector<8x64xbf16>, vector<8x64xbf16>, vector<8x8xf32> -> vector<8x8xf32>
    %cst_5 = arith.constant -1.000000e+30 : f32
    %15 = vector.broadcast %cst_5 : f32 to vector<8x8xf32>
    %16 = arith.select %7, %14, %15 : vector<8x8xi1>, vector<8x8xf32>
    %cst_6 = arith.constant dense<0xFF800000> : vector<8xf32>
    %17 = vector.multi_reduction <maximumf>, %16, %cst_6 [1] : vector<8x8xf32> to vector<8xf32>
    %18 = vector.shape_cast %17 : vector<8xf32> to vector<8x1xf32>
    %19 = vector.broadcast %18 : vector<8x1xf32> to vector<8x8xf32>
    %20 = arith.subf %16, %19 : vector<8x8xf32>
    %21 = math.exp %20 : vector<8x8xf32>
    %cst_7 = arith.constant dense<0.000000e+00> : vector<8xf32>
    %22 = vector.multi_reduction <add>, %21, %cst_7 [1] : vector<8x8xf32> to vector<8xf32>
    %23 = vector.shape_cast %22 : vector<8xf32> to vector<8x1xf32>
    %24 = arith.truncf %21 : vector<8x8xf32> to vector<8x8xbf16>
    %cst_8 = arith.constant dense<0.000000e+00> : vector<8x64xf32>
    %25 = tpu.matmul %24, %13, %cst_8 {dimension_numbers = #tpu.dot_dimension_numbers<[1], [0], [0], [1], [0, 0, 1, 1], [], []>} : vector<8x8xbf16>, vector<8x64xbf16>, vector<8x64xf32> -> vector<8x64xf32>
    %26 = tpu.reciprocal %23 {approx = true} : vector<8x1xf32> -> vector<8x1xf32>
    %27 = vector.broadcast %26 : vector<8x1xf32> to vector<8x64xf32>
    %28 = arith.mulf %25, %27 : vector<8x64xf32>
    %29 = arith.truncf %28 : vector<8x64xf32> to vector<8x64xbf16>
    %c0_9 = arith.constant 0 : index
    %c0_10 = arith.constant 0 : index
    %30 = vector.load %arg6[%c0_9, %c0_10] : memref<8x384xbf16, #tpu.memory_space<vmem>>, vector<8x64xbf16>
    tpu.vector_store %arg6[%c0_9, %c0_10], %29 {strides = array<i32>} : memref<8x384xbf16, #tpu.memory_space<vmem>>, vector<8x64xbf16>,
    %31 = vector.extract_strided_slice %4 {offsets = [0, 64], sizes = [8, 64], strides = [1, 1]} : vector<8x1152xf32> to vector<8x64xf32>
    %32 = arith.truncf %31 : vector<8x64xf32> to vector<8x64xbf16>
    %33 = vector.extract_strided_slice %4 {offsets = [0, 448], sizes = [8, 64], strides = [1, 1]} : vector<8x1152xf32> to vector<8x64xf32>
    %34 = arith.truncf %33 : vector<8x64xf32> to vector<8x64xbf16>
    %35 = vector.extract_strided_slice %4 {offsets = [0, 832], sizes = [8, 64], strides = [1, 1]} : vector<8x1152xf32> to vector<8x64xf32>
    %36 = arith.truncf %35 : vector<8x64xf32> to vector<8x64xbf16>
    %cst_11 = arith.constant dense<0.000000e+00> : vector<8x8xf32>
    %37 = tpu.matmul %32, %34, %cst_11 {dimension_numbers = #tpu.dot_dimension_numbers<[1], [1], [0], [0], [0, 0, 1, 0], [], []>} : vector<8x64xbf16>, vector<8x64xbf16>, vector<8x8xf32> -> vector<8x8xf32>
    %cst_12 = arith.constant -1.000000e+30 : f32
    %38 = vector.broadcast %cst_12 : f32 to vector<8x8xf32>
    %39 = arith.select %7, %37, %38 : vector<8x8xi1>, vector<8x8xf32>
    %cst_13 = arith.constant dense<0xFF800000> : vector<8xf32>
    %40 = vector.multi_reduction <maximumf>, %39, %cst_13 [1] : vector<8x8xf32> to vector<8xf32>
    %41 = vector.shape_cast %40 : vector<8xf32> to vector<8x1xf32>
    %42 = vector.broadcast %41 : vector<8x1xf32> to vector<8x8xf32>
    %43 = arith.subf %39, %42 : vector<8x8xf32>
    %44 = math.exp %43 : vector<8x8xf32>
    %cst_14 = arith.constant dense<0.000000e+00> : vector<8xf32>
    %45 = vector.multi_reduction <add>, %44, %cst_14 [1] : vector<8x8xf32> to vector<8xf32>
    %46 = vector.shape_cast %45 : vector<8xf32> to vector<8x1xf32>
    %47 = arith.truncf %44 : vector<8x8xf32> to vector<8x8xbf16>
    %cst_15 = arith.constant dense<0.000000e+00> : vector<8x64xf32>
    %48 = tpu.matmul %47, %36, %cst_15 {dimension_numbers = #tpu.dot_dimension_numbers<[1], [0], [0], [1], [0, 0, 1, 1], [], []>} : vector<8x8xbf16>, vector<8x64xbf16>, vector<8x64xf32> -> vector<8x64xf32>
    %49 = tpu.reciprocal %46 {approx = true} : vector<8x1xf32> -> vector<8x1xf32>
    %50 = vector.broadcast %49 : vector<8x1xf32> to vector<8x64xf32>
    %51 = arith.mulf %48, %50 : vector<8x64xf32>
    %52 = arith.truncf %51 : vector<8x64xf32> to vector<8x64xbf16>
    %c0_16 = arith.constant 0 : index
    %c64 = arith.constant 64 : index
    %53 = vector.load %arg6[%c0_16, %c64] : memref<8x384xbf16, #tpu.memory_space<vmem>>, vector<8x64xbf16>
    tpu.vector_store %arg6[%c0_16, %c64], %52 {strides = array<i32>} : memref<8x384xbf16, #tpu.memory_space<vmem>>, vector<8x64xbf16>,
    %54 = vector.extract_strided_slice %4 {offsets = [0, 128], sizes = [8, 64], strides = [1, 1]} : vector<8x1152xf32> to vector<8x64xf32>
    %55 = arith.truncf %54 : vector<8x64xf32> to vector<8x64xbf16>
    %56 = vector.extract_strided_slice %4 {offsets = [0, 512], sizes = [8, 64], strides = [1, 1]} : vector<8x1152xf32> to vector<8x64xf32>
    %57 = arith.truncf %56 : vector<8x64xf32> to vector<8x64xbf16>
    %58 = vector.extract_strided_slice %4 {offsets = [0, 896], sizes = [8, 64], strides = [1, 1]} : vector<8x1152xf32> to vector<8x64xf32>
    %59 = arith.truncf %58 : vector<8x64xf32> to vector<8x64xbf16>
    %cst_17 = arith.constant dense<0.000000e+00> : vector<8x8xf32>
    %60 = tpu.matmul %55, %57, %cst_17 {dimension_numbers = #tpu.dot_dimension_numbers<[1], [1], [0], [0], [0, 0, 1, 0], [], []>} : vector<8x64xbf16>, vector<8x64xbf16>, vector<8x8xf32> -> vector<8x8xf32>
    %cst_18 = arith.constant -1.000000e+30 : f32
    %61 = vector.broadcast %cst_18 : f32 to vector<8x8xf32>
    %62 = arith.select %7, %60, %61 : vector<8x8xi1>, vector<8x8xf32>
    %cst_19 = arith.constant dense<0xFF800000> : vector<8xf32>
    %63 = vector.multi_reduction <maximumf>, %62, %cst_19 [1] : vector<8x8xf32> to vector<8xf32>
    %64 = vector.shape_cast %63 : vector<8xf32> to vector<8x1xf32>
    %65 = vector.broadcast %64 : vector<8x1xf32> to vector<8x8xf32>
    %66 = arith.subf %62, %65 : vector<8x8xf32>
    %67 = math.exp %66 : vector<8x8xf32>
    %cst_20 = arith.constant dense<0.000000e+00> : vector<8xf32>
    %68 = vector.multi_reduction <add>, %67, %cst_20 [1] : vector<8x8xf32> to vector<8xf32>
    %69 = vector.shape_cast %68 : vector<8xf32> to vector<8x1xf32>
    %70 = arith.truncf %67 : vector<8x8xf32> to vector<8x8xbf16>
    %cst_21 = arith.constant dense<0.000000e+00> : vector<8x64xf32>
    %71 = tpu.matmul %70, %59, %cst_21 {dimension_numbers = #tpu.dot_dimension_numbers<[1], [0], [0], [1], [0, 0, 1, 1], [], []>} : vector<8x8xbf16>, vector<8x64xbf16>, vector<8x64xf32> -> vector<8x64xf32>
    %72 = tpu.reciprocal %69 {approx = true} : vector<8x1xf32> -> vector<8x1xf32>
    %73 = vector.broadcast %72 : vector<8x1xf32> to vector<8x64xf32>
    %74 = arith.mulf %71, %73 : vector<8x64xf32>
    %75 = arith.truncf %74 : vector<8x64xf32> to vector<8x64xbf16>
    %c0_22 = arith.constant 0 : index
    %c128 = arith.constant 128 : index
    %76 = vector.load %arg6[%c0_22, %c128] : memref<8x384xbf16, #tpu.memory_space<vmem>>, vector<8x64xbf16>
    tpu.vector_store %arg6[%c0_22, %c128], %75 {strides = array<i32>} : memref<8x384xbf16, #tpu.memory_space<vmem>>, vector<8x64xbf16>,
    %77 = vector.extract_strided_slice %4 {offsets = [0, 192], sizes = [8, 64], strides = [1, 1]} : vector<8x1152xf32> to vector<8x64xf32>
    %78 = arith.truncf %77 : vector<8x64xf32> to vector<8x64xbf16>
    %79 = vector.extract_strided_slice %4 {offsets = [0, 576], sizes = [8, 64], strides = [1, 1]} : vector<8x1152xf32> to vector<8x64xf32>
    %80 = arith.truncf %79 : vector<8x64xf32> to vector<8x64xbf16>
    %81 = vector.extract_strided_slice %4 {offsets = [0, 960], sizes = [8, 64], strides = [1, 1]} : vector<8x1152xf32> to vector<8x64xf32>
    %82 = arith.truncf %81 : vector<8x64xf32> to vector<8x64xbf16>
    %cst_23 = arith.constant dense<0.000000e+00> : vector<8x8xf32>
    %83 = tpu.matmul %78, %80, %cst_23 {dimension_numbers = #tpu.dot_dimension_numbers<[1], [1], [0], [0], [0, 0, 1, 0], [], []>} : vector<8x64xbf16>, vector<8x64xbf16>, vector<8x8xf32> -> vector<8x8xf32>
    %cst_24 = arith.constant -1.000000e+30 : f32
    %84 = vector.broadcast %cst_24 : f32 to vector<8x8xf32>
    %85 = arith.select %7, %83, %84 : vector<8x8xi1>, vector<8x8xf32>
    %cst_25 = arith.constant dense<0xFF800000> : vector<8xf32>
    %86 = vector.multi_reduction <maximumf>, %85, %cst_25 [1] : vector<8x8xf32> to vector<8xf32>
    %87 = vector.shape_cast %86 : vector<8xf32> to vector<8x1xf32>
    %88 = vector.broadcast %87 : vector<8x1xf32> to vector<8x8xf32>
    %89 = arith.subf %85, %88 : vector<8x8xf32>
    %90 = math.exp %89 : vector<8x8xf32>
    %cst_26 = arith.constant dense<0.000000e+00> : vector<8xf32>
    %91 = vector.multi_reduction <add>, %90, %cst_26 [1] : vector<8x8xf32> to vector<8xf32>
    %92 = vector.shape_cast %91 : vector<8xf32> to vector<8x1xf32>
    %93 = arith.truncf %90 : vector<8x8xf32> to vector<8x8xbf16>
    %cst_27 = arith.constant dense<0.000000e+00> : vector<8x64xf32>
    %94 = tpu.matmul %93, %82, %cst_27 {dimension_numbers = #tpu.dot_dimension_numbers<[1], [0], [0], [1], [0, 0, 1, 1], [], []>} : vector<8x8xbf16>, vector<8x64xbf16>, vector<8x64xf32> -> vector<8x64xf32>
    %95 = tpu.reciprocal %92 {approx = true} : vector<8x1xf32> -> vector<8x1xf32>
    %96 = vector.broadcast %95 : vector<8x1xf32> to vector<8x64xf32>
    %97 = arith.mulf %94, %96 : vector<8x64xf32>
    %98 = arith.truncf %97 : vector<8x64xf32> to vector<8x64xbf16>
    %c0_28 = arith.constant 0 : index
    %c192 = arith.constant 192 : index
    %99 = vector.load %arg6[%c0_28, %c192] : memref<8x384xbf16, #tpu.memory_space<vmem>>, vector<8x64xbf16>
    tpu.vector_store %arg6[%c0_28, %c192], %98 {strides = array<i32>} : memref<8x384xbf16, #tpu.memory_space<vmem>>, vector<8x64xbf16>,
    %100 = vector.extract_strided_slice %4 {offsets = [0, 256], sizes = [8, 64], strides = [1, 1]} : vector<8x1152xf32> to vector<8x64xf32>
    %101 = arith.truncf %100 : vector<8x64xf32> to vector<8x64xbf16>
    %102 = vector.extract_strided_slice %4 {offsets = [0, 640], sizes = [8, 64], strides = [1, 1]} : vector<8x1152xf32> to vector<8x64xf32>
    %103 = arith.truncf %102 : vector<8x64xf32> to vector<8x64xbf16>
    %104 = vector.extract_strided_slice %4 {offsets = [0, 1024], sizes = [8, 64], strides = [1, 1]} : vector<8x1152xf32> to vector<8x64xf32>
    %105 = arith.truncf %104 : vector<8x64xf32> to vector<8x64xbf16>
    %cst_29 = arith.constant dense<0.000000e+00> : vector<8x8xf32>
    %106 = tpu.matmul %101, %103, %cst_29 {dimension_numbers = #tpu.dot_dimension_numbers<[1], [1], [0], [0], [0, 0, 1, 0], [], []>} : vector<8x64xbf16>, vector<8x64xbf16>, vector<8x8xf32> -> vector<8x8xf32>
    %cst_30 = arith.constant -1.000000e+30 : f32
    %107 = vector.broadcast %cst_30 : f32 to vector<8x8xf32>
    %108 = arith.select %7, %106, %107 : vector<8x8xi1>, vector<8x8xf32>
    %cst_31 = arith.constant dense<0xFF800000> : vector<8xf32>
    %109 = vector.multi_reduction <maximumf>, %108, %cst_31 [1] : vector<8x8xf32> to vector<8xf32>
    %110 = vector.shape_cast %109 : vector<8xf32> to vector<8x1xf32>
    %111 = vector.broadcast %110 : vector<8x1xf32> to vector<8x8xf32>
    %112 = arith.subf %108, %111 : vector<8x8xf32>
    %113 = math.exp %112 : vector<8x8xf32>
    %cst_32 = arith.constant dense<0.000000e+00> : vector<8xf32>
    %114 = vector.multi_reduction <add>, %113, %cst_32 [1] : vector<8x8xf32> to vector<8xf32>
    %115 = vector.shape_cast %114 : vector<8xf32> to vector<8x1xf32>
    %116 = arith.truncf %113 : vector<8x8xf32> to vector<8x8xbf16>
    %cst_33 = arith.constant dense<0.000000e+00> : vector<8x64xf32>
    %117 = tpu.matmul %116, %105, %cst_33 {dimension_numbers = #tpu.dot_dimension_numbers<[1], [0], [0], [1], [0, 0, 1, 1], [], []>} : vector<8x8xbf16>, vector<8x64xbf16>, vector<8x64xf32> -> vector<8x64xf32>
    %118 = tpu.reciprocal %115 {approx = true} : vector<8x1xf32> -> vector<8x1xf32>
    %119 = vector.broadcast %118 : vector<8x1xf32> to vector<8x64xf32>
    %120 = arith.mulf %117, %119 : vector<8x64xf32>
    %121 = arith.truncf %120 : vector<8x64xf32> to vector<8x64xbf16>
    %c0_34 = arith.constant 0 : index
    %c256 = arith.constant 256 : index
    %122 = vector.load %arg6[%c0_34, %c256] : memref<8x384xbf16, #tpu.memory_space<vmem>>, vector<8x64xbf16>
    tpu.vector_store %arg6[%c0_34, %c256], %121 {strides = array<i32>} : memref<8x384xbf16, #tpu.memory_space<vmem>>, vector<8x64xbf16>,
    %123 = vector.extract_strided_slice %4 {offsets = [0, 320], sizes = [8, 64], strides = [1, 1]} : vector<8x1152xf32> to vector<8x64xf32>
    %124 = arith.truncf %123 : vector<8x64xf32> to vector<8x64xbf16>
    %125 = vector.extract_strided_slice %4 {offsets = [0, 704], sizes = [8, 64], strides = [1, 1]} : vector<8x1152xf32> to vector<8x64xf32>
    %126 = arith.truncf %125 : vector<8x64xf32> to vector<8x64xbf16>
    %127 = vector.extract_strided_slice %4 {offsets = [0, 1088], sizes = [8, 64], strides = [1, 1]} : vector<8x1152xf32> to vector<8x64xf32>
    %128 = arith.truncf %127 : vector<8x64xf32> to vector<8x64xbf16>
    %cst_35 = arith.constant dense<0.000000e+00> : vector<8x8xf32>
    %129 = tpu.matmul %124, %126, %cst_35 {dimension_numbers = #tpu.dot_dimension_numbers<[1], [1], [0], [0], [0, 0, 1, 0], [], []>} : vector<8x64xbf16>, vector<8x64xbf16>, vector<8x8xf32> -> vector<8x8xf32>
    %cst_36 = arith.constant -1.000000e+30 : f32
    %130 = vector.broadcast %cst_36 : f32 to vector<8x8xf32>
    %131 = arith.select %7, %129, %130 : vector<8x8xi1>, vector<8x8xf32>
    %cst_37 = arith.constant dense<0xFF800000> : vector<8xf32>
    %132 = vector.multi_reduction <maximumf>, %131, %cst_37 [1] : vector<8x8xf32> to vector<8xf32>
    %133 = vector.shape_cast %132 : vector<8xf32> to vector<8x1xf32>
    %134 = vector.broadcast %133 : vector<8x1xf32> to vector<8x8xf32>
    %135 = arith.subf %131, %134 : vector<8x8xf32>
    %136 = math.exp %135 : vector<8x8xf32>
    %cst_38 = arith.constant dense<0.000000e+00> : vector<8xf32>
    %137 = vector.multi_reduction <add>, %136, %cst_38 [1] : vector<8x8xf32> to vector<8xf32>
    %138 = vector.shape_cast %137 : vector<8xf32> to vector<8x1xf32>
    %139 = arith.truncf %136 : vector<8x8xf32> to vector<8x8xbf16>
    %cst_39 = arith.constant dense<0.000000e+00> : vector<8x64xf32>
    %140 = tpu.matmul %139, %128, %cst_39 {dimension_numbers = #tpu.dot_dimension_numbers<[1], [0], [0], [1], [0, 0, 1, 1], [], []>} : vector<8x8xbf16>, vector<8x64xbf16>, vector<8x64xf32> -> vector<8x64xf32>
    %141 = tpu.reciprocal %138 {approx = true} : vector<8x1xf32> -> vector<8x1xf32>
    %142 = vector.broadcast %141 : vector<8x1xf32> to vector<8x64xf32>
    %143 = arith.mulf %140, %142 : vector<8x64xf32>
    %144 = arith.truncf %143 : vector<8x64xf32> to vector<8x64xbf16>
    %c0_40 = arith.constant 0 : index
    %c320 = arith.constant 320 : index
    %145 = vector.load %arg6[%c0_40, %c320] : memref<8x384xbf16, #tpu.memory_space<vmem>>, vector<8x64xbf16>
    tpu.vector_store %arg6[%c0_40, %c320], %144 {strides = array<i32>} : memref<8x384xbf16, #tpu.memory_space<vmem>>, vector<8x64xbf16>,
    %c0_41 = arith.constant 0 : index
    %c0_42 = arith.constant 0 : index
    %146 = vector.load %arg6[%c0_41, %c0_42] : memref<8x384xbf16, #tpu.memory_space<vmem>>, vector<8x384xbf16>
    %c0_43 = arith.constant 0 : index
    %c0_44 = arith.constant 0 : index
    %147 = vector.load %arg3[%c0_43, %c0_44] : memref<384x384xbf16, #tpu.memory_space<vmem>>, vector<384x384xbf16>
    %cst_45 = arith.constant dense<0.000000e+00> : vector<8x384xf32>
    %148 = tpu.matmul %146, %147, %cst_45 {dimension_numbers = #tpu.dot_dimension_numbers<[1], [0], [0], [1], [0, 0, 1, 1], [], []>} : vector<8x384xbf16>, vector<384x384xbf16>, vector<8x384xf32> -> vector<8x384xf32>
    %c0_46 = arith.constant 0 : index
    %c0_47 = arith.constant 0 : index
    %149 = vector.load %arg4[%c0_46, %c0_47] : memref<1x384xf32, #tpu.memory_space<vmem>>, vector<1x384xf32>
    %150 = vector.broadcast %149 : vector<1x384xf32> to vector<8x384xf32>
    %151 = arith.addf %148, %150 : vector<8x384xf32>
    %152 = vector.shape_cast %151 : vector<8x384xf32> to vector<1x8x384xf32>
    %c0_48 = arith.constant 0 : index
    %c0_49 = arith.constant 0 : index
    %c0_50 = arith.constant 0 : index
    %153 = vector.load %arg5[%c0_48, %c0_49, %c0_50] : memref<1x8x384xf32, #tpu.memory_space<vmem>>, vector<1x8x384xf32>
    tpu.vector_store %arg5[%c0_48, %c0_49, %c0_50], %152 {strides = array<i32>} : memref<1x8x384xf32, #tpu.memory_space<vmem>>, vector<1x8x384xf32>,
    return
  }
  func.func @transform_0(%arg0: i32) -> (i32, i32, i32) {
    %c0_i32 = arith.constant 0 : i32
    %c0_i32_0 = arith.constant 0 : i32
    %c0_i32_1 = arith.constant 0 : i32
    return %arg0, %c0_i32, %c0_i32_0 : i32, i32, i32
  }
  func.func @transform_1(%arg0: i32) -> (i32, i32) {
    %c0_i32 = arith.constant 0 : i32
    %c0_i32_0 = arith.constant 0 : i32
    %c0_i32_1 = arith.constant 0 : i32
    return %c0_i32, %c0_i32_0 : i32, i32
  }
  func.func @transform_2(%arg0: i32) -> (i32, i32) {
    %c0_i32 = arith.constant 0 : i32
    %c0_i32_0 = arith.constant 0 : i32
    %c0_i32_1 = arith.constant 0 : i32
    return %c0_i32, %c0_i32_0 : i32, i32
  }
  func.func @transform_3(%arg0: i32) -> (i32, i32) {
    %c0_i32 = arith.constant 0 : i32
    %c0_i32_0 = arith.constant 0 : i32
    %c0_i32_1 = arith.constant 0 : i32
    return %c0_i32, %c0_i32_0 : i32, i32
  }
  func.func @transform_4(%arg0: i32) -> (i32, i32, i32) {
    %c0_i32 = arith.constant 0 : i32
    %c0_i32_0 = arith.constant 0 : i32
    %c0_i32_1 = arith.constant 0 : i32
    return %arg0, %c0_i32, %c0_i32_0 : i32, i32, i32
  }
}

</mosaic_0001>

<bundles_post_ra>
// kernel: tpu_custom_call.1
= control target key start
LH: loop header
LB: loop body
LE: loop exit
PB: predicated region body
PF: predicated region fallthrough
CT: control target
= control target key end

     0   :  { %9 = vsyncpa [#allocation4], 0  ;;  %s5178_s0 = inlined_call_operand.hbm [shape: f32[2,8,384], index: 0, kind: input, shape index: {}]   ;;  %s5179_s1 = inlined_call_operand.hbm [shape: bf16[384,1152], index: 1, kind: input, shape index: {}]   ;;  %s5180_s2 = inlined_call_operand.hbm [shape: bf16[384,384], index: 2, kind: input, shape index: {}]   ;;  %s5181_s3 = inlined_call_operand.vmem [shape: f32[1,384], index: 3, kind: input, shape index: {}]   ;;  %s5182_s4 = inlined_call_operand.hbm [shape: f32[2,8,384], index: 4, kind: output, shape index: {}]  }
   0x1   :  { %11 = vsyncpa [#allocation4 + $0x1], 0 }
   0x2   :  { %12 = vsyncpa [#allocation7], 0 }
   0x3   :  { %13 = vsyncpa [#allocation5], 0 }
   0x4   :  { %15 = vsyncpa [#allocation5 + $0x1], 0  ;;  %s4737_s15 = smov 0   ;;  %s4739_s16 = smov 0  }
   0x5   :  { %s4741_s17 = smov 0   ;;  %s4743_s18 = smov 0  }
   0x6 LB: > { %s4758_s19 = sadd.s32 4294967295, %s4698_s18   ;;  %s3487_s20 = sadd.s32 4294967294, %s4698_s18   ;;  %s4698_s18 = sphi %s4743_s18, %s5204_s18   ;;  %s4694_s17 = sphi %s4741_s17, %s5203_s17   ;;  %s4690_s16 = sphi %s4739_s16, %s5202_s16   ;;  %s4686_s15 = sphi %s4737_s15, %s5201_s15  }
   0x7   : > { %p41_p0 = scmp.ne.s32.totalorder %s4690_s16, %s4686_s15  ;;  %p5183_p1 = scmp.eq.s32.totalorder %s4758_s19, 0 }
   0x8   : > { %p134_p3 = scmp.eq.s32.totalorder %s3487_s20, 1  ;;  %p3488_p5 = scmp.ge.s32.totalorder %s4698_s18, 1 }
   0x9   : > { %p4767_p4 = por %p5183_p1, %p41_p0  ;;  %p141_p7 = scmp.lt.s32.totalorder %s4698_s18, 3 }
   0xa   : > { %p4772_p6 = por %p134_p3, %p41_p0  ;;  %s4700_s24 = smov [#allocation6]  }
   0xb   : > { %s5186_s21 = scalar_select %p4767_p4, 1, 0 }
   0xc   : > { %s5187_s22 = scalar_select %p4772_p6, 1, 0 }
   0xd   : > { %p4777_p8 = pnand %p3488_p5, %p141_p7  ;;  %s153_s25 = sshll.u32 %s4700_s24, 4  ;;  %s4781_s25 = int_to_ptr.vmem [resolvable:$true] %s153_s25 }
   0xe   : > { %s4701_s27 = smov [#allocation8]   ;;  %s4542_s5 = scalar_lea.hbm %s5179_s1, 27648 }
   0xf   : > { %p4044_p9 = pneg %p4777_p8  ;;  %s166_s28 = sshll.u32 %s4701_s27, 4  ;;  %s4792_s28 = int_to_ptr.vmem [resolvable:$true] %s166_s28 }
  0x10   : > { %p4543_p12 = scmp.ne.s32.totalorder %s5179_s1, %s4542_s5  ;;  %p4549_p5 = scmp.lt.u32.totalorder %s4542_s5, %s5179_s1 }
  0x11   : > { %p4788_p11 = pnand %p4044_p9, %p5183_p1 }
  0x13   : > { %p4544_p13 = pneg %p4788_p11 }
  0x15   : > { %p4545_p0 = pnand %p4544_p13, %p4543_p12 }
  0x17   : > { %p4546_p3 = pneg %p4545_p0 }
  0x19   : > { %p4551_p7 = pnand %p4549_p5, %p4546_p3 }
  0x1b   : > { %4554 = shalt.err (!%p4551_p7)
}
  0x1c   : > { %s4555_s10 = scalar_lea.vmem %s4781_s25, 27648  ;;  %p4563_p2 = scmp.lt.s32.totalorder %s4781_s25, %s4781_s25 }
  0x1d   : > { %p4556_p9 = scmp.ne.s32.totalorder %s4781_s25, %s4555_s10  ;;  %p4564_p12 = scmp.lt.s32.totalorder %s4555_s10, %s4555_s10 }
  0x1f   : > { %p4558_p10 = pnand %p4556_p9, %p4544_p13  ;;  %p4565_p0 = por %p4564_p12, %p4563_p2 }
  0x21   : > { %p4559_p1 = pneg %p4558_p10 }
  0x23   : > { %p4566_p6 = pnand %p4565_p0, %p4559_p1 }
  0x25   : > { %4569 = shalt.err (!%p4566_p6)
}
  0x26   : > { %s4702_s11 = smov 576   ;;  %s4703_s12 = smov 36  }
  0x27   : > { %4047 = dma.hbm_to_vmem [thread:$0]  (!%p4788_p11), %s5179_s1, 27648, %s4781_s25, [#allocation7], %s4702_s11, %s4702_s11, %s4703_s12  }
  0x28   : > { %s4570_s27 = scalar_lea.hbm %s5180_s2, 9216 }
  0x29   : > { %p4571_p2 = scmp.ne.s32.totalorder %s5180_s2, %s4570_s27  ;;  %p4577_p10 = scmp.lt.u32.totalorder %s4570_s27, %s5180_s2 }
  0x2b   : > { %p4573_p1 = pnand %p4571_p2, %p4544_p13 }
  0x2d   : > { %p4574_p6 = pneg %p4573_p1 }
  0x2f   : > { %p4579_p3 = pnand %p4577_p10, %p4574_p6 }
  0x31   : > { %4582 = shalt.err (!%p4579_p3)
}
  0x32   : > { %s4583_s25 = scalar_lea.vmem %s4792_s28, 9216  ;;  %p4591_p12 = scmp.lt.s32.totalorder %s4792_s28, %s4792_s28 }
  0x33   : > { %p4584_p5 = scmp.ne.s32.totalorder %s4792_s28, %s4583_s25  ;;  %p4592_p0 = scmp.lt.s32.totalorder %s4583_s25, %s4583_s25 }
  0x35   : > { %p4586_p7 = pnand %p4584_p5, %p4544_p13  ;;  %p4593_p2 = por %p4592_p0, %p4591_p12 }
  0x37   : > { %p4587_p9 = pneg %p4586_p7 }
  0x39   : > { %p4594_p1 = pnand %p4593_p2, %p4587_p9 }
  0x3b   : > { %4597 = shalt.err (!%p4594_p1)
}
  0x3c   : > { %s4704_s7 = smov 192   ;;  %s4705_s8 = smov 12  }
  0x3d   : > { %4050 = dma.hbm_to_vmem [thread:$0]  (!%p4788_p11), %s5180_s2, 9216, %s4792_s28, [#allocation7], %s4704_s7, %s4704_s7, %s4705_s8  }
  0x3e   : > { %s4847_s11 = sadd.s32 1, %s4698_s18   ;;  %s28_s13 = sadd.s32 1, %s4694_s17 }
  0x3f   : > { %s25_s12 = ssub.s32 %s4698_s18, %s4847_s11  ;;  %p35_p6 = scmp.ne.s32.totalorder %s4694_s17, %s4690_s16 }
  0x40   : > { %p26_p13 = scmp.eq.s32.totalorder %s25_s12, 0  ;;  %p36_p10 = scmp.eq.s32.totalorder %s4698_s18, 0 }
  0x41   : > { %p5190_p5 = scmp.eq.s32.totalorder %s4758_s19, 1  ;;  %p4061_p9 = scmp.lt.s32.totalorder %s4698_s18, 2 }
  0x42   : > { %s4856_s14 = scalar_select %p26_p13, %s4694_s17, %s28_s13  }
  0x43   : > { %p37_p3 = por %p36_p10, %p35_p6  ;;  %p4860_p7 = por %p5190_p5, %p35_p6 }
  0x44   : > { %s183_s26 = sand.u32 1, %s4694_s17   ;;  %s4029_s28 = smul.u32 384, %s4698_s18 }
  0x45   : > { %s5191_s20 = scalar_select %p4860_p7, 1, 0 }
  0x46   : > { %s4028_s24 = smul.u32 24, %s183_s26  ;;  %p4867_p11 = pnand %p4061_p9, %p37_p3 }
  0x47   : > { %s4874_s5 = scalar_lea.hbm %s5178_s0, %s4029_s28  ;;  %s184_s7 = scalar_lea.sflag [#allocation4], %s183_s26 }
  0x48   : > { %s187_s6 = scalar_lea.vmem [#allocation3], %s4028_s24  ;;  %s4598_s8 = scalar_lea.hbm %s4874_s5, 384 }
  0x49   : > { %s195_s25 = sshll.u32 %s187_s6, 4  ;;  %p4599_p12 = scmp.ne.s32.totalorder %s4874_s5, %s4598_s8  ;;  %s4876_s25 = int_to_ptr.vmem [resolvable:$true] %s195_s25 }
  0x4a   : > { %p4600_p0 = pneg %p4867_p11  ;;  %s4603_s12 = scalar_lea.hbm %s5178_s0, 768 }
  0x4b   : > { %p4604_p13 = scmp.lt.u32.totalorder %s4874_s5, %s5178_s0  ;;  %p4605_p6 = scmp.lt.u32.totalorder %s4603_s12, %s4598_s8 }
  0x4c   : > { %p4601_p2 = pnand %p4600_p0, %p4599_p12  ;;  %p4607_p3 = scmp.lt.u32.totalorder %s4598_s8, %s4874_s5 }
  0x4d   : > { %p4606_p10 = por %p4605_p6, %p4604_p13 }
  0x4e   : > { %p4602_p1 = pneg %p4601_p2 }
  0x4f   : > { %p4608_p5 = por %p4607_p3, %p4606_p10 }
  0x51   : > { %p4609_p9 = pnand %p4608_p5, %p4602_p1 }
  0x53   : > { %4612 = shalt.err (!%p4609_p9)
}
  0x54   : > { %s4613_s26 = scalar_lea.vmem %s4876_s25, 384  ;;  %s4706_s24 = smov [#allocation3]  }
  0x55   : > { %p4614_p12 = scmp.ne.s32.totalorder %s4876_s25, %s4613_s26  ;;  %s4618_s29 = sshll.u32 %s4706_s24, 4  ;;  %s4619_s29 = int_to_ptr.vmem [resolvable:$false] %s4618_s29 }
  0x56   : > { %s4620_s30 = scalar_lea.vmem %s4619_s29, 768  ;;  %p4621_p4 = scmp.lt.s32.totalorder %s4876_s25, %s4619_s29 }
  0x57   : > { %p4616_p2 = pnand %p4614_p12, %p4600_p0  ;;  %p4622_p13 = scmp.lt.s32.totalorder %s4620_s30, %s4613_s26 }
  0x59   : > { %p4617_p7 = pneg %p4616_p2  ;;  %p4623_p6 = por %p4622_p13, %p4621_p4 }
  0x5b   : > { %p4624_p10 = pnand %p4623_p6, %p4617_p7 }
  0x5d   : > { %4627 = shalt.err (!%p4624_p10)
}
  0x5e   : > { %4054 = dma.hbm_to_vmem [thread:$0]  (!%p4867_p11), %s4874_s5, 384, %s4876_s25, %s184_s7  }
  0x5f   : > { %204 = sbr.rel (%p4777_p8) target bundleno = 1843 (0x733), region = 36  ;;  %s4906_s6 = sand.u32 (!%p4777_p8), 1, %s4690_s16  }
  0x60   : > { %s4030_s8 = smul.u32 (!%p4777_p8), 24, %s4906_s6  ;;  %s207_s9 = scalar_lea.sflag (!%p4777_p8), [#allocation4], %s4906_s6 }
  0x61   : > { %p5193_p4 = scmp.ne.s32.totalorder (!%p4777_p8), %s5186_s21, 0 }
  0x62   : > { %s4912_s10 = scalar_lea.vmem (!%p4777_p8), [#allocation3], %s4030_s8 }
  0x66   : > { %4673 = dma.done.wait (%p5193_p4), %s207_s9, 384  }
  0x67   : > { %4675 = vsyncadd (%p5193_p4), %s207_s9, 4294966912  ;;  %p5194_p7 = scmp.eq.s32.totalorder %s4758_s19, 0 }
  0x69   : > { %4677 = dma.done.wait (%p5194_p7), [#allocation7], 36864   ;;  %p5195_p8 = pmov %p5194_p7 }
  0x6a   : > { %v4107_v0 = vld [vmem:[#allocation6 + $0x4] ss:$36 sps:$4 sm:$0xff]   ;;  %v4109_v1 = vld [vmem:[#allocation6 + $0xc] ss:$36 sps:$4 sm:$0xff]   ;;  %v4115_v5 = vld [vmem:[#allocation6 + $0x54] ss:$36 sps:$4 sm:$0xff]  }
  0x6b   : > { %4679 = vsyncadd (%p5195_p8), [#allocation7], 4294930432  ;;  %1594 = vmatprep.subr.bf16.mxu0 %v4107_v0  ;;  %v4111_v2 = vld [vmem:[#allocation6] ss:$36 sps:$4 sm:$0xff]   ;;  %v4112_v3 = vld [vmem:[#allocation6 + $0x8] ss:$36 sps:$4 sm:$0xff]   ;;  %1676 = vmatprep.subr.bf16.mxu1 %v4109_v1 }
  0x6c   : > { %v4113_v4 = vld [vmem:[#allocation6 + $0x4c] ss:$36 sps:$4 sm:$0xff]   ;;  %1595 = vmatpush1.bf16.msra.mxu0 %v4111_v2  ;;  %1677 = vmatpush1.bf16.msra.mxu1 %v4112_v3  ;;  %v4119_v8 = vld [vmem:[#allocation6 + $0x94] ss:$36 sps:$4 sm:$0xff]   ;;  %v4121_v9 = vld [vmem:[#allocation6 + $0x9c] ss:$36 sps:$4 sm:$0xff]  }
  0x6d   : > { %v4117_v6 = vld [vmem:[#allocation6 + $0x48] ss:$36 sps:$4 sm:$0xff]   ;;  %1596 = vmatprep.subr.bf16.mxu0 %v4113_v4  ;;  %v4118_v7 = vld [vmem:[#allocation6 + $0x50] ss:$36 sps:$4 sm:$0xff]   ;;  %1678 = vmatprep.subr.bf16.mxu1 %v4115_v5  ;;  %v4124_v11 = vld [vmem:[#allocation6 + $0x98] ss:$36 sps:$4 sm:$0xff]  }
  0x6e   : > { %v4123_v10 = vld [vmem:[#allocation6 + $0x90] ss:$36 sps:$4 sm:$0xff]   ;;  %v4125_v12 = vld [vmem:[#allocation6 + $0xdc] ss:$36 sps:$4 sm:$0xff]   ;;  %v4127_v13 = vld [vmem:[#allocation6 + $0xe4] ss:$36 sps:$4 sm:$0xff]  }
  0x6f   : > { %v4129_v14 = vld [vmem:[#allocation6 + $0xd8] ss:$36 sps:$4 sm:$0xff]   ;;  %v4130_v15 = vld [vmem:[#allocation6 + $0xe0] ss:$36 sps:$4 sm:$0xff]   ;;  %v4133_v17 = vld [vmem:[#allocation6 + $0x12c] ss:$36 sps:$4 sm:$0xff]  }
  0x70   : > { %1597 = vmatpush1.bf16.msra.mxu0 %v4117_v6  ;;  %1679 = vmatpush1.bf16.msra.mxu1 %v4118_v7  ;;  %v4131_v16 = vld [vmem:[#allocation6 + $0x124] ss:$36 sps:$4 sm:$0xff]   ;;  %v4137_v20 = vld [vmem:[#allocation6 + $0x16c] ss:$36 sps:$4 sm:$0xff]   ;;  %v4139_v21 = vld [vmem:[#allocation6 + $0x174] ss:$36 sps:$4 sm:$0xff]  }
  0x71   : > { %1598 = vmatprep.subr.bf16.mxu0 %v4119_v8  ;;  %1680 = vmatprep.subr.bf16.mxu1 %v4121_v9  ;;  %v4135_v18 = vld [vmem:[#allocation6 + $0x120] ss:$36 sps:$4 sm:$0xff]   ;;  %v4136_v19 = vld [vmem:[#allocation6 + $0x128] ss:$36 sps:$4 sm:$0xff]   ;;  %v4142_v23 = vld [vmem:[#allocation6 + $0x170] ss:$36 sps:$4 sm:$0xff]  }
  0x72   : > { %v4141_v22 = vld [vmem:[#allocation6 + $0x168] ss:$36 sps:$4 sm:$0xff]   ;;  %v4143_v24 = vld [vmem:[#allocation6 + $0x1b4] ss:$36 sps:$4 sm:$0xff]   ;;  %v4145_v25 = vld [vmem:[#allocation6 + $0x1bc] ss:$36 sps:$4 sm:$0xff]  }
  0x73   : > { %v4147_v26 = vld [vmem:[#allocation6 + $0x1b0] ss:$36 sps:$4 sm:$0xff]   ;;  %v4148_v27 = vld [vmem:[#allocation6 + $0x1b8] ss:$36 sps:$4 sm:$0xff]   ;;  %v4151_v29 = vld [vmem:[#allocation6 + $0x204] ss:$36 sps:$4 sm:$0xff]  }
  0x74   : > { %1599 = vmatpush1.bf16.msra.mxu0 %v4123_v10  ;;  %1681 = vmatpush1.bf16.msra.mxu1 %v4124_v11  ;;  %v4149_v28 = vld [vmem:[#allocation6 + $0x1fc] ss:$36 sps:$4 sm:$0xff]   ;;  %v4155_v32 = vld [vmem:[#allocation6 + $0x244] ss:$36 sps:$4 sm:$0xff]   ;;  %v4157_v33 = vld [vmem:[#allocation6 + $0x24c] ss:$36 sps:$4 sm:$0xff]  }
  0x75   : > { %1600 = vmatprep.subr.bf16.mxu0 %v4125_v12  ;;  %1682 = vmatprep.subr.bf16.mxu1 %v4127_v13  ;;  %v4153_v30 = vld [vmem:[#allocation6 + $0x1f8] ss:$36 sps:$4 sm:$0xff]   ;;  %v4154_v31 = vld [vmem:[#allocation6 + $0x200] ss:$36 sps:$4 sm:$0xff]   ;;  %v4160_v35 = vld [vmem:[#allocation6 + $0x248] ss:$36 sps:$4 sm:$0xff]  }
  0x76   : > { %v4159_v34 = vld [vmem:[#allocation6 + $0x240] ss:$36 sps:$4 sm:$0xff]   ;;  %v4161_v36 = vld [vmem:[#allocation6 + $0x28c] ss:$36 sps:$4 sm:$0xff]   ;;  %v4163_v37 = vld [vmem:[#allocation6 + $0x294] ss:$36 sps:$4 sm:$0xff]  }
  0x77   : > { %v4165_v38 = vld [vmem:[#allocation6 + $0x288] ss:$36 sps:$4 sm:$0xff]   ;;  %v4166_v39 = vld [vmem:[#allocation6 + $0x290] ss:$36 sps:$4 sm:$0xff]   ;;  %v4169_v41 = vld [vmem:[#allocation6 + $0x2dc] ss:$36 sps:$4 sm:$0xff]  }
  0x78   : > { %1601 = vmatpush1.bf16.msra.mxu0 %v4129_v14  ;;  %1683 = vmatpush1.bf16.msra.mxu1 %v4130_v15  ;;  %v4167_v40 = vld [vmem:[#allocation6 + $0x2d4] ss:$36 sps:$4 sm:$0xff]   ;;  %v4173_v44 = vld [vmem:[#allocation6 + $0x31c] ss:$36 sps:$4 sm:$0xff]   ;;  %v4175_v45 = vld [vmem:[#allocation6 + $0x324] ss:$36 sps:$4 sm:$0xff]  }
  0x79   : > { %1602 = vmatprep.subr.bf16.mxu0 %v4131_v16  ;;  %1684 = vmatprep.subr.bf16.mxu1 %v4133_v17  ;;  %v4171_v42 = vld [vmem:[#allocation6 + $0x2d0] ss:$36 sps:$4 sm:$0xff]   ;;  %v4172_v43 = vld [vmem:[#allocation6 + $0x2d8] ss:$36 sps:$4 sm:$0xff]   ;;  %v4178_v49 = vld [vmem:[#allocation6 + $0x320] ss:$36 sps:$4 sm:$0xff]  }
  0x7a   : > { %v245_v46 = vld [vmem:[%s4912_s10 + $0x8] sm:$0xff]  ;;  %v4179_v50 = vld [vmem:[#allocation6 + $0x364] ss:$36 sps:$4 sm:$0xff]   ;;  %v4707_v14 = vmov 0   ;;  %vm4709_vm0 = vmmov 0   ;;  %vm2010_vm1 = vcmask 523264  }
  0x7b   : > { %v4177_v47 = vld [vmem:[#allocation6 + $0x318] ss:$36 sps:$4 sm:$0xff]   ;;  %v4923_v48 = vpack.c.bf16 %v245_v46, %v245_v46  ;;  %v4181_v51 = vld [vmem:[#allocation6 + $0x36c] ss:$36 sps:$4 sm:$0xff]   ;;  %v4183_v52 = vld [vmem:[#allocation6 + $0x360] ss:$36 sps:$4 sm:$0xff]  }
  0x7c   : > { %1603 = vmatpush1.bf16.msra.mxu0 %v4135_v18  ;;  %1685 = vmatpush1.bf16.msra.mxu1 %v4136_v19  ;;  %v4184_v53 = vld [vmem:[#allocation6 + $0x368] ss:$36 sps:$4 sm:$0xff]   ;;  %v4187_v55 = vld [vmem:[#allocation6 + $0x3b4] ss:$36 sps:$4 sm:$0xff]   ;;  %v4193_v59 = vld [vmem:[#allocation6 + $0x3fc] ss:$36 sps:$4 sm:$0xff]  }
  0x7d   : > { %1604 = vmatprep.subr.bf16.mxu0 %v4137_v20  ;;  %1686 = vmatprep.subr.bf16.mxu1 %v4139_v21  ;;  %v4185_v54 = vld [vmem:[#allocation6 + $0x3ac] ss:$36 sps:$4 sm:$0xff]   ;;  %v4191_v58 = vld [vmem:[#allocation6 + $0x3f4] ss:$36 sps:$4 sm:$0xff]   ;;  %v4197_v62 = vld [vmem:[#allocation6 + $0x43c] ss:$36 sps:$4 sm:$0xff]  }
  0x7e   : > { %1626 = vmatprep.mubr.bf16.mxu0 %v4923_v48  ;;  %1708 = vmatprep.mubr.bf16.mxu1 %v4923_v48  ;;  %v4189_v56 = vld [vmem:[#allocation6 + $0x3a8] ss:$36 sps:$4 sm:$0xff]   ;;  %v4190_v57 = vld [vmem:[#allocation6 + $0x3b0] ss:$36 sps:$4 sm:$0xff]   ;;  %v4196_v61 = vld [vmem:[#allocation6 + $0x3f8] ss:$36 sps:$4 sm:$0xff]  }
  0x7f   : > { %v4195_v60 = vld [vmem:[#allocation6 + $0x3f0] ss:$36 sps:$4 sm:$0xff]   ;;  %v4199_v63 = vld [vmem:[#allocation6 + $0x444] ss:$36 sps:$4 sm:$0xff]   ;;  %v4201_v0 = vld [vmem:[#allocation6 + $0x438] ss:$36 sps:$4 sm:$0xff]  }
  0x80   : > { %1605 = vmatpush1.bf16.msra.mxu0 %v4141_v22  ;;  %1687 = vmatpush1.bf16.msra.mxu1 %v4142_v23  ;;  %v4202_v1 = vld [vmem:[#allocation6 + $0x440] ss:$36 sps:$4 sm:$0xff]   ;;  %v244_v2 = vld [vmem:[%s4912_s10] sm:$0xff]  ;;  %v4218_v16 = vld [vmem:[#allocation6 + $0x518] ss:$36 sps:$4 sm:$0xff]   ;;  %s4710_s21 = smov 64  }
  0x81   : > { %1606 = vmatprep.subr.bf16.mxu0 %v4143_v24  ;;  %1688 = vmatprep.subr.bf16.mxu1 %v4145_v25  ;;  %v4205_v3 = vld [vmem:[#allocation6 + $0x484] ss:$36 sps:$4 sm:$0xff]   ;;  %v4208_v4 = vld [vmem:[#allocation6 + $0x48c] ss:$36 sps:$4 sm:$0xff]   ;;  %v4928_v5 = vpack.c.bf16 %v244_v2, %v244_v2  ;;  %v4214_v9 = vld [vmem:[#allocation6 + $0x4d4] ss:$36 sps:$4 sm:$0xff]  }
  0x82   : > { %v4203_v6 = vld [vmem:[#allocation6 + $0x480] ss:$36 sps:$4 sm:$0xff]   ;;  %v4206_v7 = vld [vmem:[#allocation6 + $0x488] ss:$36 sps:$4 sm:$0xff]   ;;  %v4212_v11 = vld [vmem:[#allocation6 + $0x4d0] ss:$36 sps:$4 sm:$0xff]  }
  0x83   : > { %v4211_v8 = vld [vmem:[#allocation6 + $0x4cc] ss:$36 sps:$4 sm:$0xff]   ;;  %v4217_v12 = vld [vmem:[#allocation6 + $0x514] ss:$36 sps:$4 sm:$0xff]   ;;  %v4220_v13 = vld [vmem:[#allocation6 + $0x51c] ss:$36 sps:$4 sm:$0xff]  }
  0x84   : > { %1607 = vmatpush1.bf16.msra.mxu0 %v4147_v26  ;;  %1689 = vmatpush1.bf16.msra.mxu1 %v4148_v27  ;;  %v4209_v10 = vld [vmem:[#allocation6 + $0x4c8] ss:$36 sps:$4 sm:$0xff]   ;;  %v4215_v15 = vld [vmem:[#allocation6 + $0x510] ss:$36 sps:$4 sm:$0xff]   ;;  %v4223_v17 = vld [vmem:[#allocation6 + $0x55c] ss:$36 sps:$4 sm:$0xff]  }
  0x85   : > { %1608 = vmatprep.subr.bf16.mxu0 %v4149_v28  ;;  %1690 = vmatprep.subr.bf16.mxu1 %v4151_v29  ;;  %v4226_v18 = vld [vmem:[#allocation6 + $0x564] ss:$36 sps:$4 sm:$0xff]   ;;  %v4221_v19 = vld [vmem:[#allocation6 + $0x558] ss:$36 sps:$4 sm:$0xff]   ;;  %v4232_v22 = vld [vmem:[#allocation6 + $0x5ac] ss:$36 sps:$4 sm:$0xff]  }
  0x86   : > { %v4224_v20 = vld [vmem:[#allocation6 + $0x560] ss:$36 sps:$4 sm:$0xff]   ;;  %v4230_v24 = vld [vmem:[#allocation6 + $0x5a8] ss:$36 sps:$4 sm:$0xff]   ;;  %v4238_v26 = vld [vmem:[#allocation6 + $0x5f4] ss:$36 sps:$4 sm:$0xff]  }
  0x87   : > { %v4229_v21 = vld [vmem:[#allocation6 + $0x5a4] ss:$36 sps:$4 sm:$0xff]   ;;  %v4235_v25 = vld [vmem:[#allocation6 + $0x5ec] ss:$36 sps:$4 sm:$0xff]   ;;  %v4241_v29 = vld [vmem:[#allocation6 + $0x634] ss:$36 sps:$4 sm:$0xff]  }
  0x88   : > { %1609 = vmatpush1.bf16.msra.mxu0 %v4153_v30  ;;  %1691 = vmatpush1.bf16.msra.mxu1 %v4154_v31  ;;  %v4227_v23 = vld [vmem:[#allocation6 + $0x5a0] ss:$36 sps:$4 sm:$0xff]   ;;  %v4233_v27 = vld [vmem:[#allocation6 + $0x5e8] ss:$36 sps:$4 sm:$0xff]   ;;  %v4236_v28 = vld [vmem:[#allocation6 + $0x5f0] ss:$36 sps:$4 sm:$0xff]  }
  0x89   : > { %1610 = vmatprep.subr.bf16.mxu0 %v4155_v32  ;;  %1692 = vmatprep.subr.bf16.mxu1 %v4157_v33  ;;  %v4244_v30 = vld [vmem:[#allocation6 + $0x63c] ss:$36 sps:$4 sm:$0xff]   ;;  %v4239_v31 = vld [vmem:[#allocation6 + $0x630] ss:$36 sps:$4 sm:$0xff]   ;;  %v4259_v46 = vld [vmem:[#allocation6 + $0xa4] ss:$36 sps:$4 sm:$0xff]  }
  0x8a   : > { %v4242_v32 = vld [vmem:[#allocation6 + $0x638] ss:$36 sps:$4 sm:$0xff]   ;;  %v4269_v2 = vld [vmem:[#allocation6 + $0x1c0] ss:$36 sps:$4 sm:$0xff]   ;;  %vm2072_vm2 = vcmask 1043456   ;;  %vm2058_vm4 = vcmask 64512  }
  0x8b   : > { %v4247_v33 = vld [vmem:[#allocation6 + $0x67c] ss:$36 sps:$4 sm:$0xff]   ;;  %vm2119_vm5 = vcmask 519168   ;;  %vm2242_vm6 = vcmask 1043968   ;;  %s4031_s5 = smul.u32 384, %s4758_s19  ;;  %s242_s25 = scalar_lea.vmem [#allocation9], %s4030_s8 }
  0x8c   : > { %1611 = vmatpush1.bf16.msra.mxu0 %v4159_v34  ;;  %1693 = vmatpush1.bf16.msra.mxu1 %v4160_v35  ;;  %v4250_v34 = vld [vmem:[#allocation6 + $0x684] ss:$36 sps:$4 sm:$0xff]   ;;  %v4245_v35 = vld [vmem:[#allocation6 + $0x678] ss:$36 sps:$4 sm:$0xff]   ;;  %s3398_s7 = sshll.u32 %s242_s25, 4  ;;  %s3384_s19 = scalar_lea.sflag [#allocation5], %s4906_s6  ;;  %s5136_s7 = int_to_ptr.vmem [resolvable:$true] %s3398_s7 }
  0x8d   : > { %1612 = vmatprep.subr.bf16.mxu0 %v4161_v36  ;;  %1694 = vmatprep.subr.bf16.mxu1 %v4163_v37  ;;  %v4248_v36 = vld [vmem:[#allocation6 + $0x680] ss:$36 sps:$4 sm:$0xff]   ;;  %s5134_s28 = scalar_lea.hbm %s5182_s4, %s4031_s5  ;;  %s4628_s26 = scalar_lea.vmem %s5136_s7, 384 }
  0x8e   : > { %v246_v37 = vld [vmem:[%s4912_s10 + $0x10] sm:$0xff]  ;;  %p4629_p11 = scmp.ne.s32.totalorder %s5136_s7, %s4628_s26  ;;  %p5198_p0 = scmp.ne.s32.totalorder %s5191_s20, 0 }
  0x8f   : > { %s4711_s24 = smov [#allocation9]  }
  0x90   : > { %1613 = vmatpush1.bf16.msra.mxu0 %v4165_v38  ;;  %1695 = vmatpush1.bf16.msra.mxu1 %v4166_v39  ;;  %v4253_v38 = vld [vmem:[#allocation6 + $0x14] ss:$36 sps:$4 sm:$0xff]   ;;  %v4292_v39 = vld [vmem:[#allocation6 + $0x1c] ss:$36 sps:$4 sm:$0xff]   ;;  %p4630_p1 = pnand %p4629_p11, %p5198_p0  ;;  %s4632_s29 = sshll.u32 %s4711_s24, 4  ;;  %s4633_s29 = int_to_ptr.vmem [resolvable:$false] %s4632_s29 }
  0x91   : > { %1614 = vmatprep.subr.bf16.mxu0 %v4167_v40  ;;  %1696 = vmatprep.subr.bf16.mxu1 %v4169_v41  ;;  %v4935_v40 = vpack.c.bf16 %v246_v37, %v246_v37  ;;  %v4251_v41 = vld [vmem:[#allocation6 + $0x10] ss:$36 sps:$4 sm:$0xff]   ;;  %s4634_s30 = scalar_lea.vmem %s4633_s29, 768  ;;  %p4635_p5 = scmp.lt.s32.totalorder %s5136_s7, %s4633_s29 }
  0x92   : > { %v4307_v37 = vld [vmem:[#allocation6 + $0x44c] ss:$36 sps:$4 sm:$0xff]   ;;  %p4631_p3 = pneg %p4630_p1  ;;  %p4636_p9 = scmp.lt.s32.totalorder %s4634_s30, %s4628_s26 }
  0x94   : > { %1615 = vmatpush1.bf16.msra.mxu0 %v4171_v42  ;;  %1697 = vmatpush1.bf16.msra.mxu1 %v4172_v43  ;;  %v4256_v42 = vld [vmem:[#allocation6 + $0x5c] ss:$36 sps:$4 sm:$0xff]   ;;  %p4637_p12 = por %p4636_p9, %p4635_p5 }
  0x95   : > { %1616 = vmatprep.subr.bf16.mxu0 %v4173_v44  ;;  %1698 = vmatprep.subr.bf16.mxu1 %v4175_v45  ;;  %v4290_v43 = vld [vmem:[#allocation6 + $0x18] ss:$36 sps:$4 sm:$0xff]   ;;  %v4298_v44 = vld [vmem:[#allocation6 + $0x64] ss:$36 sps:$4 sm:$0xff]  }
  0x96   : > { %v4254_v45 = vld [vmem:[#allocation6 + $0x58] ss:$36 sps:$4 sm:$0xff]   ;;  %p4638_p2 = pnand %p4637_p12, %p4631_p3 }
  0x98   : > { %1617 = vmatpush1.bf16.msra.mxu0 %v4177_v47  ;;  %1699 = vmatpush1.bf16.msra.mxu1 %v4178_v49  ;;  %v4296_v47 = vld [vmem:[#allocation6 + $0x60] ss:$36 sps:$4 sm:$0xff]   ;;  %v4304_v49 = vld [vmem:[#allocation6 + $0xac] ss:$36 sps:$4 sm:$0xff]  }
  0x99   : > { %1618 = vmatprep.subr.bf16.mxu0 %v4179_v50  ;;  %1700 = vmatprep.subr.bf16.mxu1 %v4181_v51  ;;  %v4257_v50 = vld [vmem:[#allocation6 + $0xa0] ss:$36 sps:$4 sm:$0xff]   ;;  %v4262_v51 = vld [vmem:[#allocation6 + $0xec] ss:$36 sps:$4 sm:$0xff]  }
  0x9c   : > { %1619 = vmatpush1.bf16.msra.mxu0 %v4183_v52  ;;  %1701 = vmatpush1.bf16.msra.mxu1 %v4184_v53  ;;  %v4302_v52 = vld [vmem:[#allocation6 + $0xa8] ss:$36 sps:$4 sm:$0xff]   ;;  %v4310_v53 = vld [vmem:[#allocation6 + $0xf4] ss:$36 sps:$4 sm:$0xff]  }
  0x9d   : > { %1620 = vmatprep.subr.bf16.mxu0 %v4185_v54  ;;  %1702 = vmatprep.subr.bf16.mxu1 %v4187_v55  ;;  %v4260_v54 = vld [vmem:[#allocation6 + $0xe8] ss:$36 sps:$4 sm:$0xff]   ;;  %v4265_v55 = vld [vmem:[#allocation6 + $0x134] ss:$36 sps:$4 sm:$0xff]  }
  0xa0   : > { %1621 = vmatpush1.bf16.msra.mxu0 %v4189_v56  ;;  %1703 = vmatpush1.bf16.msra.mxu1 %v4190_v57  ;;  %v4308_v56 = vld [vmem:[#allocation6 + $0xf0] ss:$36 sps:$4 sm:$0xff]   ;;  %v4316_v57 = vld [vmem:[#allocation6 + $0x13c] ss:$36 sps:$4 sm:$0xff]  }
  0xa1   : > { %1622 = vmatprep.subr.bf16.mxu0 %v4191_v58  ;;  %1704 = vmatprep.subr.bf16.mxu1 %v4193_v59  ;;  %v4263_v58 = vld [vmem:[#allocation6 + $0x130] ss:$36 sps:$4 sm:$0xff]   ;;  %v4268_v59 = vld [vmem:[#allocation6 + $0x17c] ss:$36 sps:$4 sm:$0xff]  }
  0xa4   : > { %1623 = vmatpush1.bf16.msra.mxu0 %v4195_v60  ;;  %1705 = vmatpush1.bf16.msra.mxu1 %v4196_v61  ;;  %v4314_v60 = vld [vmem:[#allocation6 + $0x138] ss:$36 sps:$4 sm:$0xff]   ;;  %v4322_v61 = vld [vmem:[#allocation6 + $0x184] ss:$36 sps:$4 sm:$0xff]  }
  0xa5   : > { %1624 = vmatprep.subr.bf16.mxu0 %v4197_v62  ;;  %1706 = vmatprep.subr.bf16.mxu1 %v4199_v63  ;;  %v4266_v62 = vld [vmem:[#allocation6 + $0x178] ss:$36 sps:$4 sm:$0xff]   ;;  %v4271_v63 = vld [vmem:[#allocation6 + $0x1c4] ss:$36 sps:$4 sm:$0xff]  }
  0xa8   : > { %1625 = vmatpush1.bf16.msra.mxu0 %v4201_v0  ;;  %1707 = vmatpush1.bf16.msra.mxu1 %v4202_v1  ;;  %v4320_v0 = vld [vmem:[#allocation6 + $0x180] ss:$36 sps:$4 sm:$0xff]   ;;  %v4328_v1 = vld [vmem:[#allocation6 + $0x1cc] ss:$36 sps:$4 sm:$0xff]  }
  0xa9   : > { %1635 = vmatprep.subr.bf16.mxu0 %v4205_v3  ;;  %1717 = vmatprep.subr.bf16.mxu1 %v4208_v4  ;;  %v4274_v3 = vld [vmem:[#allocation6 + $0x20c] ss:$36 sps:$4 sm:$0xff]  }
  0xaa   : > { %v4326_v4 = vld [vmem:[#allocation6 + $0x1c8] ss:$36 sps:$4 sm:$0xff]  }
  0xab   : > { %1627 = vmatmul.mubr.bf16.vlgmr.msra.gmra.mrb[0].mxu0 %v4928_v5  ;;  %1709 = vmatmul.mubr.bf16.vlgmr.msra.gmra.mrb[0].mxu1 %v4928_v5 }
  0xac   : > { %1636 = vmatpush1.bf16.msra.mxu0 %v4203_v6  ;;  %1718 = vmatpush1.bf16.msra.mxu1 %v4206_v7  ;;  %v4334_v6 = vld [vmem:[#allocation6 + $0x214] ss:$36 sps:$4 sm:$0xff]   ;;  %v4272_v7 = vld [vmem:[#allocation6 + $0x208] ss:$36 sps:$4 sm:$0xff]  }
  0xad   : > { %1637 = vmatprep.subr.bf16.mxu0 %v4211_v8  ;;  %1719 = vmatprep.subr.bf16.mxu1 %v4214_v9  ;;  %v4277_v8 = vld [vmem:[#allocation6 + $0x254] ss:$36 sps:$4 sm:$0xff]  }
  0xae   : > { %1667 = vmatprep.mubr.bf16.mxu0 %v4707_v14  ;;  %1749 = vmatprep.mubr.bf16.mxu1 %v4707_v14  ;;  %v4332_v9 = vld [vmem:[#allocation6 + $0x210] ss:$36 sps:$4 sm:$0xff]  }
  0xb0   : > { %1638 = vmatpush1.bf16.msra.mxu0 %v4209_v10  ;;  %1720 = vmatpush1.bf16.msra.mxu1 %v4212_v11  ;;  %v4340_v10 = vld [vmem:[#allocation6 + $0x25c] ss:$36 sps:$4 sm:$0xff]   ;;  %v4275_v11 = vld [vmem:[#allocation6 + $0x250] ss:$36 sps:$4 sm:$0xff]  }
  0xb1   : > { %1639 = vmatprep.subr.bf16.mxu0 %v4217_v12  ;;  %1721 = vmatprep.subr.bf16.mxu1 %v4220_v13  ;;  %v4280_v12 = vld [vmem:[#allocation6 + $0x29c] ss:$36 sps:$4 sm:$0xff]  }
  0xb2   : > { %v4338_v13 = vld [vmem:[#allocation6 + $0x258] ss:$36 sps:$4 sm:$0xff]  }
  0xb4   : > { %1640 = vmatpush1.bf16.msra.mxu0 %v4215_v15  ;;  %1722 = vmatpush1.bf16.msra.mxu1 %v4218_v16  ;;  %v4346_v15 = vld [vmem:[#allocation6 + $0x2a4] ss:$36 sps:$4 sm:$0xff]   ;;  %v4278_v16 = vld [vmem:[#allocation6 + $0x298] ss:$36 sps:$4 sm:$0xff]  }
  0xb5   : > { %1641 = vmatprep.subr.bf16.mxu0 %v4223_v17  ;;  %1723 = vmatprep.subr.bf16.mxu1 %v4226_v18  ;;  %v4283_v17 = vld [vmem:[#allocation6 + $0x2e4] ss:$36 sps:$4 sm:$0xff]  }
  0xb6   : > { %v4344_v18 = vld [vmem:[#allocation6 + $0x2a0] ss:$36 sps:$4 sm:$0xff]  }
  0xb8   : > { %1642 = vmatpush1.bf16.msra.mxu0 %v4221_v19  ;;  %1724 = vmatpush1.bf16.msra.mxu1 %v4224_v20  ;;  %v4352_v19 = vld [vmem:[#allocation6 + $0x2ec] ss:$36 sps:$4 sm:$0xff]   ;;  %v4281_v20 = vld [vmem:[#allocation6 + $0x2e0] ss:$36 sps:$4 sm:$0xff]  }
  0xb9   : > { %1643 = vmatprep.subr.bf16.mxu0 %v4229_v21  ;;  %1725 = vmatprep.subr.bf16.mxu1 %v4232_v22  ;;  %v4286_v21 = vld [vmem:[#allocation6 + $0x32c] ss:$36 sps:$4 sm:$0xff]  }
  0xba   : > { %v4350_v22 = vld [vmem:[#allocation6 + $0x2e8] ss:$36 sps:$4 sm:$0xff]  }
  0xbc   : > { %1644 = vmatpush1.bf16.msra.mxu0 %v4227_v23  ;;  %1726 = vmatpush1.bf16.msra.mxu1 %v4230_v24  ;;  %v4358_v23 = vld [vmem:[#allocation6 + $0x334] ss:$36 sps:$4 sm:$0xff]   ;;  %v4284_v24 = vld [vmem:[#allocation6 + $0x328] ss:$36 sps:$4 sm:$0xff]  }
  0xbd   : > { %1645 = vmatprep.subr.bf16.mxu0 %v4235_v25  ;;  %1727 = vmatprep.subr.bf16.mxu1 %v4238_v26  ;;  %v4289_v25 = vld [vmem:[#allocation6 + $0x374] ss:$36 sps:$4 sm:$0xff]  }
  0xbe   : > { %v4356_v26 = vld [vmem:[#allocation6 + $0x330] ss:$36 sps:$4 sm:$0xff]  }
  0xc0   : > { %1646 = vmatpush1.bf16.msra.mxu0 %v4233_v27  ;;  %1728 = vmatpush1.bf16.msra.mxu1 %v4236_v28  ;;  %v4361_v27 = vld [vmem:[#allocation6 + $0x37c] ss:$36 sps:$4 sm:$0xff]   ;;  %v4287_v28 = vld [vmem:[#allocation6 + $0x370] ss:$36 sps:$4 sm:$0xff]  }
  0xc1   : > { %1647 = vmatprep.subr.bf16.mxu0 %v4241_v29  ;;  %1729 = vmatprep.subr.bf16.mxu1 %v4244_v30  ;;  %v4295_v29 = vld [vmem:[#allocation6 + $0x3bc] ss:$36 sps:$4 sm:$0xff]  }
  0xc2   : > { %v4359_v30 = vld [vmem:[#allocation6 + $0x378] ss:$36 sps:$4 sm:$0xff]  }
  0xc4   : > { %1648 = vmatpush1.bf16.msra.mxu0 %v4239_v31  ;;  %1730 = vmatpush1.bf16.msra.mxu1 %v4242_v32  ;;  %v4364_v31 = vld [vmem:[#allocation6 + $0x3c4] ss:$36 sps:$4 sm:$0xff]   ;;  %v4293_v32 = vld [vmem:[#allocation6 + $0x3b8] ss:$36 sps:$4 sm:$0xff]  }
  0xc5   : > { %1649 = vmatprep.subr.bf16.mxu0 %v4247_v33  ;;  %1731 = vmatprep.subr.bf16.mxu1 %v4250_v34  ;;  %v4301_v33 = vld [vmem:[#allocation6 + $0x404] ss:$36 sps:$4 sm:$0xff]  }
  0xc6   : > { %v4362_v34 = vld [vmem:[#allocation6 + $0x3c0] ss:$36 sps:$4 sm:$0xff]  }
  0xc8   : > { %1650 = vmatpush1.bf16.msra.mxu0 %v4245_v35  ;;  %1732 = vmatpush1.bf16.msra.mxu1 %v4248_v36  ;;  %v4367_v35 = vld [vmem:[#allocation6 + $0x40c] ss:$36 sps:$4 sm:$0xff]   ;;  %v4299_v36 = vld [vmem:[#allocation6 + $0x400] ss:$36 sps:$4 sm:$0xff]  }
  0xc9   : > { %1758 = vmatprep.subr.bf16.mxu0 %v4253_v38  ;;  %1840 = vmatprep.subr.bf16.mxu1 %v4292_v39  ;;  %v4365_v38 = vld [vmem:[#allocation6 + $0x408] ss:$36 sps:$4 sm:$0xff]   ;;  %v4370_v39 = vld [vmem:[#allocation6 + $0x454] ss:$36 sps:$4 sm:$0xff]  }
  0xcb   : > { %1668 = vmatmul.mubr.bf16.vlgmr.msra.gmra.mrb[0].mxu0 %v4935_v40  ;;  %1750 = vmatmul.mubr.bf16.vlgmr.msra.gmra.mrb[0].mxu1 %v4935_v40 }
  0xcc   : > { %1759 = vmatpush1.bf16.msra.mxu0 %v4251_v41  ;;  %1841 = vmatpush1.bf16.msra.mxu1 %v4290_v43  ;;  %v4305_v41 = vld [vmem:[#allocation6 + $0x448] ss:$36 sps:$4 sm:$0xff]   ;;  %v4313_v43 = vld [vmem:[#allocation6 + $0x494] ss:$36 sps:$4 sm:$0xff]  }
  0xcd   : > { %1760 = vmatprep.subr.bf16.mxu0 %v4256_v42  ;;  %1842 = vmatprep.subr.bf16.mxu1 %v4298_v44  ;;  %v4368_v42 = vld [vmem:[#allocation6 + $0x450] ss:$36 sps:$4 sm:$0xff]   ;;  %v4373_v44 = vld [vmem:[#allocation6 + $0x49c] ss:$36 sps:$4 sm:$0xff]  }
  0xce   : > { %1790 = vmatprep.mubr.bf16.mxu0 %v4923_v48  ;;  %1872 = vmatprep.mubr.bf16.mxu1 %v4923_v48 }
  0xd0   : > { %1761 = vmatpush1.bf16.msra.mxu0 %v4254_v45  ;;  %1843 = vmatpush1.bf16.msra.mxu1 %v4296_v47  ;;  %v4311_v45 = vld [vmem:[#allocation6 + $0x490] ss:$36 sps:$4 sm:$0xff]   ;;  %v4371_v47 = vld [vmem:[#allocation6 + $0x498] ss:$36 sps:$4 sm:$0xff]  }
  0xd1   : > { %1762 = vmatprep.subr.bf16.mxu0 %v4259_v46  ;;  %1844 = vmatprep.subr.bf16.mxu1 %v4304_v49  ;;  %v4319_v46 = vld [vmem:[#allocation6 + $0x4dc] ss:$36 sps:$4 sm:$0xff]   ;;  %v4376_v49 = vld [vmem:[#allocation6 + $0x4e4] ss:$36 sps:$4 sm:$0xff]  }
  0xd4   : > { %1763 = vmatpush1.bf16.msra.mxu0 %v4257_v50  ;;  %1845 = vmatpush1.bf16.msra.mxu1 %v4302_v52  ;;  %v4317_v50 = vld [vmem:[#allocation6 + $0x4d8] ss:$36 sps:$4 sm:$0xff]   ;;  %v4374_v52 = vld [vmem:[#allocation6 + $0x4e0] ss:$36 sps:$4 sm:$0xff]  }
  0xd5   : > { %1764 = vmatprep.subr.bf16.mxu0 %v4262_v51  ;;  %1846 = vmatprep.subr.bf16.mxu1 %v4310_v53  ;;  %v4325_v51 = vld [vmem:[#allocation6 + $0x524] ss:$36 sps:$4 sm:$0xff]   ;;  %v4379_v53 = vld [vmem:[#allocation6 + $0x52c] ss:$36 sps:$4 sm:$0xff]  }
  0xd8   : > { %1765 = vmatpush1.bf16.msra.mxu0 %v4260_v54  ;;  %1847 = vmatpush1.bf16.msra.mxu1 %v4308_v56  ;;  %v4323_v54 = vld [vmem:[#allocation6 + $0x520] ss:$36 sps:$4 sm:$0xff]   ;;  %v4377_v56 = vld [vmem:[#allocation6 + $0x528] ss:$36 sps:$4 sm:$0xff]  }
  0xd9   : > { %1766 = vmatprep.subr.bf16.mxu0 %v4265_v55  ;;  %1848 = vmatprep.subr.bf16.mxu1 %v4316_v57  ;;  %v4331_v55 = vld [vmem:[#allocation6 + $0x56c] ss:$36 sps:$4 sm:$0xff]   ;;  %v4382_v57 = vld [vmem:[#allocation6 + $0x574] ss:$36 sps:$4 sm:$0xff]  }
  0xdc   : > { %1767 = vmatpush1.bf16.msra.mxu0 %v4263_v58  ;;  %1849 = vmatpush1.bf16.msra.mxu1 %v4314_v60  ;;  %v4329_v58 = vld [vmem:[#allocation6 + $0x568] ss:$36 sps:$4 sm:$0xff]   ;;  %v4380_v60 = vld [vmem:[#allocation6 + $0x570] ss:$36 sps:$4 sm:$0xff]  }
  0xdd   : > { %1768 = vmatprep.subr.bf16.mxu0 %v4268_v59  ;;  %1850 = vmatprep.subr.bf16.mxu1 %v4322_v61  ;;  %v4337_v59 = vld [vmem:[#allocation6 + $0x5b4] ss:$36 sps:$4 sm:$0xff]   ;;  %v4385_v61 = vld [vmem:[#allocation6 + $0x5bc] ss:$36 sps:$4 sm:$0xff]  }
  0xe0   : > { %1769 = vmatpush1.bf16.msra.mxu0 %v4266_v62  ;;  %1851 = vmatpush1.bf16.msra.mxu1 %v4320_v0  ;;  %v4335_v62 = vld [vmem:[#allocation6 + $0x5b0] ss:$36 sps:$4 sm:$0xff]   ;;  %v4383_v0 = vld [vmem:[#allocation6 + $0x5b8] ss:$36 sps:$4 sm:$0xff]  }
  0xe1   : > { %1770 = vmatprep.subr.bf16.mxu0 %v4271_v63  ;;  %1852 = vmatprep.subr.bf16.mxu1 %v4328_v1  ;;  %v4343_v63 = vld [vmem:[#allocation6 + $0x5fc] ss:$36 sps:$4 sm:$0xff]   ;;  %v4388_v1 = vld [vmem:[#allocation6 + $0x604] ss:$36 sps:$4 sm:$0xff]  }
  0xe4   : > { %1771 = vmatpush1.bf16.msra.mxu0 %v4269_v2  ;;  %1853 = vmatpush1.bf16.msra.mxu1 %v4326_v4  ;;  %v4341_v2 = vld [vmem:[#allocation6 + $0x5f8] ss:$36 sps:$4 sm:$0xff]   ;;  %v4386_v4 = vld [vmem:[#allocation6 + $0x600] ss:$36 sps:$4 sm:$0xff]  }
  0xe5   : > { %1772 = vmatprep.subr.bf16.mxu0 %v4274_v3  ;;  %1854 = vmatprep.subr.bf16.mxu1 %v4334_v6  ;;  %v4349_v3 = vld [vmem:[#allocation6 + $0x644] ss:$36 sps:$4 sm:$0xff]   ;;  %v4391_v6 = vld [vmem:[#allocation6 + $0x64c] ss:$36 sps:$4 sm:$0xff]  }
  0xe8   : > { %1773 = vmatpush1.bf16.msra.mxu0 %v4272_v7  ;;  %1855 = vmatpush1.bf16.msra.mxu1 %v4332_v9  ;;  %v4347_v7 = vld [vmem:[#allocation6 + $0x640] ss:$36 sps:$4 sm:$0xff]   ;;  %v4389_v9 = vld [vmem:[#allocation6 + $0x648] ss:$36 sps:$4 sm:$0xff]  }
  0xe9   : > { %1774 = vmatprep.subr.bf16.mxu0 %v4277_v8  ;;  %1856 = vmatprep.subr.bf16.mxu1 %v4340_v10  ;;  %v4355_v8 = vld [vmem:[#allocation6 + $0x68c] ss:$36 sps:$4 sm:$0xff]   ;;  %v4394_v10 = vld [vmem:[#allocation6 + $0x694] ss:$36 sps:$4 sm:$0xff]  }
  0xec   : > { %1775 = vmatpush1.bf16.msra.mxu0 %v4275_v11  ;;  %1857 = vmatpush1.bf16.msra.mxu1 %v4338_v13  ;;  %v4353_v11 = vld [vmem:[#allocation6 + $0x688] ss:$36 sps:$4 sm:$0xff]   ;;  %v4396_v13 = vld [vmem:[#allocation6 + $0x260] ss:$36 sps:$4 sm:$0xff]  }
  0xed   : > { %1776 = vmatprep.subr.bf16.mxu0 %v4280_v12  ;;  %1858 = vmatprep.subr.bf16.mxu1 %v4346_v15  ;;  %v4392_v12 = vld [vmem:[#allocation6 + $0x690] ss:$36 sps:$4 sm:$0xff]   ;;  %v4397_v15 = vld [vmem:[#allocation6 + $0x20] ss:$36 sps:$4 sm:$0xff]  }
  0xf0   : > { %1777 = vmatpush1.bf16.msra.mxu0 %v4278_v16  ;;  %1859 = vmatpush1.bf16.msra.mxu1 %v4344_v18  ;;  %v4395_v16 = vld [vmem:[#allocation6 + $0x4a0] ss:$36 sps:$4 sm:$0xff]   ;;  %v4708_v18 = vmov 0.0  }
  0xf1   : > { %1778 = vmatprep.subr.bf16.mxu0 %v4283_v17  ;;  %1860 = vmatprep.subr.bf16.mxu1 %v4352_v19  ;;  %v4399_v17 = vld [vmem:[#allocation6 + $0x2a8] ss:$36 sps:$4 sm:$0xff]  }
  0xf2   : > { %v4400_v19 = vld [vmem:[#allocation6 + $0x68] ss:$36 sps:$4 sm:$0xff]  }
  0xf4   : > { %1779 = vmatpush1.bf16.msra.mxu0 %v4281_v20  ;;  %1861 = vmatpush1.bf16.msra.mxu1 %v4350_v22  ;;  %v4398_v20 = vld [vmem:[#allocation6 + $0x4e8] ss:$36 sps:$4 sm:$0xff]   ;;  %v4403_v22 = vld [vmem:[#allocation6 + $0xb0] ss:$36 sps:$4 sm:$0xff]  }
  0xf5   : > { %1780 = vmatprep.subr.bf16.mxu0 %v4286_v21  ;;  %1862 = vmatprep.subr.bf16.mxu1 %v4358_v23  ;;  %v4402_v21 = vld [vmem:[#allocation6 + $0x2f0] ss:$36 sps:$4 sm:$0xff]  }
  0xf6   : > { %v4401_v23 = vld [vmem:[#allocation6 + $0x530] ss:$36 sps:$4 sm:$0xff]  }
  0xf8   : > { %1781 = vmatpush1.bf16.msra.mxu0 %v4284_v24  ;;  %1863 = vmatpush1.bf16.msra.mxu1 %v4356_v26  ;;  %v4405_v24 = vld [vmem:[#allocation6 + $0x338] ss:$36 sps:$4 sm:$0xff]  }
  0xf9   : > { %1782 = vmatprep.subr.bf16.mxu0 %v4289_v25  ;;  %1864 = vmatprep.subr.bf16.mxu1 %v4361_v27  ;;  %v4406_v25 = vld [vmem:[#allocation6 + $0xf8] ss:$36 sps:$4 sm:$0xff]   ;;  %v4408_v27 = vld [vmem:[#allocation6 + $0x380] ss:$36 sps:$4 sm:$0xff]  }
  0xfa   : > { %v4404_v26 = vld [vmem:[#allocation6 + $0x578] ss:$36 sps:$4 sm:$0xff]  }
  0xfc   : > { %1783 = vmatpush1.bf16.msra.mxu0 %v4287_v28  ;;  %1865 = vmatpush1.bf16.msra.mxu1 %v4359_v30  ;;  %v4407_v28 = vld [vmem:[#allocation6 + $0x5c0] ss:$36 sps:$4 sm:$0xff]   ;;  %v4412_v30 = vld [vmem:[#allocation6 + $0x188] ss:$36 sps:$4 sm:$0xff]  }
  0xfd   : > { %1784 = vmatprep.subr.bf16.mxu0 %v4295_v29  ;;  %1866 = vmatprep.subr.bf16.mxu1 %v4364_v31  ;;  %v4411_v29 = vld [vmem:[#allocation6 + $0x3c8] ss:$36 sps:$4 sm:$0xff]  }
  0xfe   : > { %v4410_v31 = vld [vmem:[#allocation6 + $0x608] ss:$36 sps:$4 sm:$0xff]  }
 0x100   : > { %1785 = vmatpush1.bf16.msra.mxu0 %v4293_v32  ;;  %1867 = vmatpush1.bf16.msra.mxu1 %v4362_v34  ;;  %v4414_v32 = vld [vmem:[#allocation6 + $0x410] ss:$36 sps:$4 sm:$0xff]  }
 0x101   : > { %1786 = vmatprep.subr.bf16.mxu0 %v4301_v33  ;;  %1868 = vmatprep.subr.bf16.mxu1 %v4367_v35  ;;  %v4415_v33 = vld [vmem:[#allocation6 + $0x1d0] ss:$36 sps:$4 sm:$0xff]   ;;  %v4417_v35 = vld [vmem:[#allocation6 + $0x458] ss:$36 sps:$4 sm:$0xff]  }
 0x102   : > { %v4413_v34 = vld [vmem:[#allocation6 + $0x650] ss:$36 sps:$4 sm:$0xff]  }
 0x104   : > { %1787 = vmatpush1.bf16.msra.mxu0 %v4299_v36  ;;  %1869 = vmatpush1.bf16.msra.mxu1 %v4365_v38  ;;  %v4418_v36 = vld [vmem:[#allocation6 + $0x218] ss:$36 sps:$4 sm:$0xff]  }
 0x105   : > { %1788 = vmatprep.subr.bf16.mxu0 %v4307_v37  ;;  %1870 = vmatprep.subr.bf16.mxu1 %v4370_v39  ;;  %v4416_v37 = vld [vmem:[#allocation6 + $0x698] ss:$36 sps:$4 sm:$0xff]  }
 0x108   : > { %1789 = vmatpush1.bf16.msra.mxu0 %v4305_v41  ;;  %1871 = vmatpush1.bf16.msra.mxu1 %v4368_v42 }
 0x109   : > { %1799 = vmatprep.subr.bf16.mxu0 %v4313_v43  ;;  %1881 = vmatprep.subr.bf16.mxu1 %v4373_v44 }
 0x10b   : > { %1791 = vmatmul.mubr.bf16.vlgmr.msra.gmra.mrb[4].mxu0 %v4928_v5  ;;  %1873 = vmatmul.mubr.bf16.vlgmr.msra.gmra.mrb[4].mxu1 %v4928_v5 }
 0x10c   : > { %1800 = vmatpush1.bf16.msra.mxu0 %v4311_v45  ;;  %1831 = vmatprep.mubr.bf16.mxu0 %v4707_v14 }
 0x10d   : > { %1801 = vmatprep.subr.bf16.mxu0 %v4319_v46  ;;  %1882 = vmatpush1.bf16.msra.mxu1 %v4371_v47 }
 0x10e   : > { %1883 = vmatprep.subr.bf16.mxu1 %v4376_v49  ;;  %1913 = vmatprep.mubr.bf16.mxu1 %v4707_v14 }
 0x110   : > { %1802 = vmatpush1.bf16.msra.mxu0 %v4317_v50 }
 0x111   : > { %1803 = vmatprep.subr.bf16.mxu0 %v4325_v51  ;;  %1884 = vmatpush1.bf16.msra.mxu1 %v4374_v52 }
 0x112   : > { %1885 = vmatprep.subr.bf16.mxu1 %v4379_v53 }
 0x114   : > { %1804 = vmatpush1.bf16.msra.mxu0 %v4323_v54 }
 0x115   : > { %1805 = vmatprep.subr.bf16.mxu0 %v4331_v55  ;;  %1886 = vmatpush1.bf16.msra.mxu1 %v4377_v56 }
 0x116   : > { %1887 = vmatprep.subr.bf16.mxu1 %v4382_v57 }
 0x118   : > { %1806 = vmatpush1.bf16.msra.mxu0 %v4329_v58 }
 0x119   : > { %1807 = vmatprep.subr.bf16.mxu0 %v4337_v59  ;;  %1888 = vmatpush1.bf16.msra.mxu1 %v4380_v60 }
 0x11a   : > { %1889 = vmatprep.subr.bf16.mxu1 %v4385_v61 }
 0x11c   : > { %1808 = vmatpush1.bf16.msra.mxu0 %v4335_v62 }
 0x11d   : > { %1809 = vmatprep.subr.bf16.mxu0 %v4343_v63  ;;  %1890 = vmatpush1.bf16.msra.mxu1 %v4383_v0 }
 0x11e   : > { %1891 = vmatprep.subr.bf16.mxu1 %v4388_v1 }
 0x120   : > { %1810 = vmatpush1.bf16.msra.mxu0 %v4341_v2 }
 0x121   : > { %1811 = vmatprep.subr.bf16.mxu0 %v4349_v3  ;;  %1892 = vmatpush1.bf16.msra.mxu1 %v4386_v4 }
 0x122   : > { %1893 = vmatprep.subr.bf16.mxu1 %v4391_v6 }
 0x124   : > { %1812 = vmatpush1.bf16.msra.mxu0 %v4347_v7 }
 0x125   : > { %1813 = vmatprep.subr.bf16.mxu0 %v4355_v8  ;;  %1894 = vmatpush1.bf16.msra.mxu1 %v4389_v9 }
 0x126   : > { %1895 = vmatprep.subr.bf16.mxu1 %v4394_v10 }
 0x128   : > { %1814 = vmatpush1.bf16.msra.mxu0 %v4353_v11 }
 0x129   : > { %1896 = vmatpush1.bf16.msra.mxu1 %v4392_v12  ;;  %3808 = vmatprep.subr.bf16.mxu0 %v4396_v13  ;;  %v2002_v13 = vlaneseq }
 0x12a   : > { %3894 = vmatprep.subr.bf16.mxu1 %v4708_v18 }
 0x12b   : > { %1832 = vmatmul.mubr.bf16.vlgmr.msra.gmra.mrb[4].mxu0 %v4935_v40 }
 0x12c   : > { %1914 = vmatmul.mubr.bf16.vlgmr.msra.gmra.mrb[4].mxu1 %v4935_v40  ;;  %3809 = vmatpush3.bf16.msra.mxu0 %v4397_v15 }
 0x12d   : > { %3895 = vmatpush3.bf16.msra.mxu1 %v4395_v16  ;;  %3810 = vmatprep.subr.bf16.mxu0 %v4399_v17  ;;  %v4995_v16 = vshrl.u32 %v2002_v13, 7  ;;  %v2005_v17 = vand.u32 127, %v2002_v13 }
 0x12e   : > { %3896 = vmatprep.subr.bf16.mxu1 %v4708_v18  ;;  %1954 = vmatprep.mubr.bf16.mxu0 %v4923_v48  ;;  %v4409_v48 = vld [vmem:[#allocation6 + $0x140] ss:$36 sps:$4 sm:$0xff]  }
 0x12f   : > { %3910 = vmatprep.mubr.msk.bf16.mxu1 %vm4709_vm0, %v4708_v18  ;;  %vm4999_vm3 = vcmp.le.s32.totalorder %v2005_v17, %v4995_v16 }
 0x130   : > { %3811 = vmatpush3.bf16.msra.mxu0 %v4400_v19 }
 0x131   : > { %3897 = vmatpush3.bf16.msra.mxu1 %v4398_v20  ;;  %3812 = vmatprep.subr.bf16.mxu0 %v4402_v21 }
 0x132   : > { %3898 = vmatprep.subr.bf16.mxu1 %v4708_v18 }
 0x134   : > { %3813 = vmatpush3.bf16.msra.mxu0 %v4403_v22 }
 0x135   : > { %3899 = vmatpush3.bf16.msra.mxu1 %v4401_v23  ;;  %3814 = vmatprep.subr.bf16.mxu0 %v4405_v24 }
 0x136   : > { %3900 = vmatprep.subr.bf16.mxu1 %v4708_v18 }
 0x138   : > { %3815 = vmatpush3.bf16.msra.mxu0 %v4406_v25 }
 0x139   : > { %3901 = vmatpush3.bf16.msra.mxu1 %v4404_v26  ;;  %3816 = vmatprep.subr.bf16.mxu0 %v4408_v27 }
 0x13a   : > { %3902 = vmatprep.subr.bf16.mxu1 %v4708_v18 }
 0x13c   : > { %3817 = vmatpush3.bf16.msra.mxu0 %v4409_v48 }
 0x13d   : > { %3903 = vmatpush3.bf16.msra.mxu1 %v4407_v28  ;;  %3818 = vmatprep.subr.bf16.mxu0 %v4411_v29 }
 0x13e   : > { %3904 = vmatprep.subr.bf16.mxu1 %v4708_v18 }
 0x140   : > { %3819 = vmatpush3.bf16.msra.mxu0 %v4412_v30 }
 0x141   : > { %3905 = vmatpush3.bf16.msra.mxu1 %v4410_v31  ;;  %3820 = vmatprep.subr.bf16.mxu0 %v4414_v32 }
 0x142   : > { %3906 = vmatprep.subr.bf16.mxu1 %v4708_v18 }
 0x144   : > { %3821 = vmatpush3.bf16.msra.mxu0 %v4415_v33 }
 0x145   : > { %3907 = vmatpush3.bf16.msra.mxu1 %v4413_v34  ;;  %3822 = vmatprep.subr.bf16.mxu0 %v4417_v35 }
 0x146   : > { %3908 = vmatprep.subr.bf16.mxu1 %v4708_v18 }
 0x148   : > { %3823 = vmatpush3.bf16.msra.mxu0 %v4418_v36 }
 0x149   : > { %3909 = vmatpush3.bf16.msra.mxu1 %v4416_v37  ;;  %3938 = vmatprep.subr.bf16.mxu0 %v4708_v18 }
 0x14a   : > { %3914 = vmatprep.subr.bf16.mxu1 %v4708_v18 }
 0x14b   : > { %1955 = vmatmul.mubr.bf16.vlgmr.msra.gmra.mrb[8].mxu0 %v4928_v5 }
 0x14c   : > { %3911 = vmatmul.mubr.bf16.vlgmr.msra.gmra.mrb[8].mxu1 %v4935_v40  ;;  %3940 = vmatprep.mubr.msk.bf16.mxu0 %vm4709_vm0, %v4708_v18 }
 0x14d   : > { %3916 = vmatprep.mubr.msk.bf16.mxu1 %vm4709_vm0, %v4708_v18 }
 0x19e   : > { %v1669_v38 = vpop.f32.mrb[0].mxu0  ;;  %v1751_v39 = vpop.f32.mrb[0].mxu1 }
 0x19f   : > { %v2007_v41 = vpack.c.bf16 %v1669_v38, %v1669_v38  ;;  %v1671_v42 = vpop.f32.mrb[1].mxu0  ;;  %v1753_v43 = vpop.f32.mrb[1].mxu1  ;;  %v2476_v63 = vpack.c.bf16 %v1751_v39, %v1751_v39 }
 0x1a0   : > { %v4966_v44 = vpack.c.bf16 %v1753_v43, %v1753_v43  ;;  %v1673_v45 = vpop.f32.mrb[2].mxu0  ;;  %v1755_v46 = vpop.f32.mrb[2].mxu1  ;;  %v2244_v61 = vpack.c.bf16 %v1671_v42, %v1671_v42 }
 0x1a1   : > { %v1756_v47 = vpop.f32.mrb[3].mxu1  ;;  %2122 = vrot.lane.b32.xlu1 %v2007_v41, %s4710_s21  ;;  %v1674_v5 = vpop.f32.mrb[3].mxu0 }
 0x1a2   : > { %v2015_v40 = vsel %vm2010_vm1, %v4966_v44, 0 }
 0x1a3   : > { %3915 = vmatpush3.bf16.xpose.msra.mxu1 %v2015_v40 }
 0x1a4   : > { %3920 = vmatprep.subr.bf16.mxu1 %v4708_v18 }
 0x1aa   : > { %3917 = vmatmul.mubr.msk.bf16.vlgmr.msra.gmra.mrb[12].mxu1 %vm2010_vm1, %v2007_v41 }
 0x1ab   : > { %3922 = vmatprep.mubr.msk.bf16.mxu1 %vm4709_vm0, %v4708_v18 }
 0x1fe   : > { %v1833_v49 = vpop.f32.mrb[4].mxu0 }
 0x1ff   : > { %v2245_v50 = vpack.c.bf16 %v1833_v49, %v1833_v49  ;;  %v1835_v51 = vpop.f32.mrb[5].mxu0  ;;  %v1915_v52 = vpop.f32.mrb[4].mxu1 }
 0x200   : > { %v4975_v53 = vpack.c.bf16 %v1915_v52, %v1915_v52  ;;  %v4977_v54 = vpop.f32.mrb[5].mxu1  ;;  %v1837_v55 = vpop.f32.mrb[6].mxu0  ;;  %v2477_v62 = vpack.c.bf16 %v1835_v51, %v1835_v51 }
 0x201   : > { %v2251_v56 = vsel %vm2010_vm1, %v2245_v50, 0  ;;  %2358 = vrot.lane.b32.xlu1 %v2245_v50, %s4710_s21  ;;  %v1919_v57 = vpop.f32.mrb[6].mxu1  ;;  %v1838_v58 = vpop.f32.mrb[7].mxu0  ;;  %v2246_v13 = vpack.c.bf16 %v4977_v54, %v4977_v54 }
 0x202   : > { %3939 = vmatpush3.bf16.xpose.msra.mxu0 %v2251_v56  ;;  %v2074_v59 = vsel %vm2072_vm2, %v4975_v53, 0  ;;  %v1920_v60 = vpop.f32.mrb[7].mxu1  ;;  %v2483_v19 = vsel %vm2010_vm1, %v2477_v62, 0 }
 0x203   : > { %3921 = vmatpush3.bf16.msra.mxu1 %v2074_v59  ;;  %3950 = vmatprep.subr.bf16.mxu0 %v4708_v18 }
 0x204   : > { %3926 = vmatprep.subr.bf16.mxu1 %v4708_v18 }
 0x205   : > { %2355 = vrot.lane.b32.xlu1 %v2244_v61, %s4710_s21 }
 0x209   : > { %3941 = vmatmul.mubr.msk.bf16.vlgmr.msra.gmra.mrb[12].mxu0 %vm2010_vm1, %v2244_v61  ;;  %2590 = vrot.lane.b32.xlu1 %v2477_v62, %s4710_s21 }
 0x20a   : > { %3952 = vmatprep.mubr.msk.bf16.mxu0 %vm4709_vm0, %v4708_v18 }
 0x20d   : > { %2587 = vrot.lane.b32.xlu1 %v2476_v63, %s4710_s21 }
 0x213   : > { %v2123_v11 = vpop.permute.xlu1 %2122 }
 0x21e   : > { %v3824_v0 = vpop.f32.mrb[8].mxu0 }
 0x21f   : > { %v1996_v1 = vpop.f32.mrb[8].mxu1  ;;  %v3825_v2 = vpop.f32.mrb[9].mxu0 }
 0x220   : > { %v3826_v3 = vadd.f32 %v3825_v2, %v3824_v0  ;;  %v3912_v4 = vpop.f32.mrb[9].mxu1  ;;  %v3827_v6 = vpop.f32.mrb[10].mxu0 }
 0x221   : > { %v1999_v7 = vpop.f32.mrb[10].mxu1  ;;  %v3828_v8 = vpop.f32.mrb[11].mxu0 }
 0x222   : > { %v4991_v9 = vadd.f32 %v3826_v3, %v1996_v1  ;;  %v3913_v10 = vpop.f32.mrb[11].mxu1 }
 0x273   : > { %v2359_v12 = vpop.permute.xlu1 %2358 }
 0x274   : > { %v2364_v15 = vsel %vm2010_vm1, %v2359_v12, 0 }
 0x275   : > { %3951 = vmatpush3.bf16.xpose.msra.mxu0 %v2364_v15  ;;  %v2478_v15 = vpack.c.bf16 %v4991_v9, %v4991_v9 }
 0x276   : > { %3962 = vmatprep.subr.bf16.mxu0 %v4708_v18 }
 0x277   : > { %v2356_v20 = vpop.permute.xlu1 %2355 }
 0x27b   : > { %v2591_v48 = vpop.permute.xlu1 %2590 }
 0x27c   : > { %3953 = vmatmul.mubr.msk.bf16.vlgmr.msra.gmra.mrb[16].mxu0 %vm2010_vm1, %v2356_v20  ;;  %v2596_v28 = vsel %vm2010_vm1, %v2591_v48, 0 }
 0x27d   : > { %v2051_v22 = vpop.f32.mrb[12].mxu1  ;;  %3963 = vmatpush3.bf16.xpose.msra.mxu0 %v2483_v19  ;;  %3964 = vmatprep.mubr.msk.bf16.mxu0 %vm4709_vm0, %v4708_v18 }
 0x27e   : > { %v2057_v23 = vsel %vm4999_vm3, %v2051_v22, -1e+30  ;;  %v3918_v24 = vpop.f32.mrb[13].mxu1  ;;  %3974 = vmatprep.subr.bf16.mxu0 %v4708_v18 }
 0x27f   : > { %v2054_v25 = vpop.f32.mrb[14].mxu1  ;;  %v2059_v26 = vsel %vm2058_vm4, %v2057_v23, -inf  ;;  %v2588_v29 = vpop.permute.xlu1 %2587 }
 0x280   : > { %2060 = vmax.xlane.f32.xlu0 %v2059_v26  ;;  %v3919_v27 = vpop.f32.mrb[15].mxu1 }
 0x284   : > { %3965 = vmatmul.mubr.msk.bf16.vlgmr.msra.gmra.mrb[20].mxu0 %vm2010_vm1, %v2476_v63 }
 0x285   : > { %3975 = vmatpush3.bf16.xpose.msra.mxu0 %v2596_v28  ;;  %3976 = vmatprep.mubr.msk.bf16.mxu0 %vm4709_vm0, %v4708_v18 }
 0x28c   : > { %3977 = vmatmul.mubr.msk.bf16.vlgmr.msra.gmra.mrb[24].mxu0 %vm2010_vm1, %v2588_v29 }
 0x296   : > { %2125 = vrot.lane.b32.xlu0 %v4966_v44, %s4710_s21 }
 0x2dc   : > { %v2287_v30 = vpop.f32.mrb[12].mxu0 }
 0x2dd   : > { %v5019_v31 = vsel %vm4999_vm3, %v2287_v30, -1e+30  ;;  %v3942_v32 = vpop.f32.mrb[13].mxu0 }
 0x2de   : > { %v2290_v33 = vpop.f32.mrb[14].mxu0  ;;  %v2294_v34 = vsel %vm2058_vm4, %v5019_v31, -inf }
 0x2df   : > { %2295 = vmax.xlane.f32.xlu0 %v2294_v34  ;;  %v3943_v35 = vpop.f32.mrb[15].mxu0 }
 0x2f5   : > { %2185 = vrot.lane.b32.xlu0 %v4975_v53, %s4710_s21 }
 0x30d   : > { %v2061_v36 = vpop.xlane.xlu0 %2060 }
 0x30e   : > { %v2062_v37 = vsub.f32 %v2057_v23, %v2061_v36 }
 0x310   : > { %v2063_v38 = vmul.f32 1.442695, %v2062_v37 }
 0x311   : > { %v2126_v41 = vpop.permute.xlu0 %2125 }
 0x312   : > { %4518 = vpow2.f32 %v2063_v38  ;;  %v2131_v43 = vsel %vm2010_vm1, %v2126_v41, 0 }
 0x31c   : > { %v5025_v39 = vpop.eup %4518 }
 0x31d   : > { %v2068_v42 = vpack.c.bf16 %v5025_v39, %v5025_v39 }
 0x31f   : > { %3923 = vmatmul.mubr.msk.bf16.vlgmr.msra.gmra.mrb[16].mxu1 %vm2058_vm4, %v2068_v42 }
 0x320   : > { %3927 = vmatpush3.bf16.xpose.msra.mxu1 %v2131_v43  ;;  %3928 = vmatprep.mubr.msk.bf16.mxu1 %vm4709_vm0, %v4708_v18 }
 0x321   : > { %3932 = vmatprep.subr.bf16.mxu1 %v4708_v18 }
 0x327   : > { %3929 = vmatmul.mubr.msk.bf16.vlgmr.msra.gmra.mrb[20].mxu1 %vm2010_vm1, %v2123_v11 }
 0x328   : > { %3934 = vmatprep.mubr.msk.bf16.mxu1 %vm4709_vm0, %v4708_v18 }
 0x34f   : > { %v2400_v44 = vpop.f32.mrb[16].mxu0 }
 0x350   : > { %v3954_v45 = vpop.f32.mrb[17].mxu0  ;;  %v2406_v7 = vsel %vm4999_vm3, %v2400_v44, -1e+30  ;;  %v2065_v44 = vsel %vm2058_vm4, %v5025_v39, 0.0 }
 0x351   : > { %v2403_v46 = vpop.f32.mrb[18].mxu0  ;;  %v2407_v10 = vsel %vm2058_vm4, %v2406_v7, -inf }
 0x352   : > { %v3955_v47 = vpop.f32.mrb[19].mxu0  ;;  %v2540_v46 = vsel %vm2072_vm2, %v2478_v15, 0 }
 0x357   : > { %v2519_v5 = vpop.f32.mrb[20].mxu0 }
 0x358   : > { %v3966_v40 = vpop.f32.mrb[21].mxu0  ;;  %v2525_v11 = vsel %vm4999_vm3, %v2519_v5, -1e+30 }
 0x359   : > { %v2522_v49 = vpop.f32.mrb[22].mxu0  ;;  %v2526_v12 = vsel %vm2058_vm4, %v2525_v11, -inf }
 0x35a   : > { %v3967_v50 = vpop.f32.mrb[23].mxu0 }
 0x35b   : > { %v4419_v50 = vld [vmem:[#allocation8] ss:$12 sps:$4 sm:$0xff]  }
 0x35f   : > { %v2632_v51 = vpop.f32.mrb[24].mxu0 }
 0x360   : > { %v2638_v52 = vsel %vm4999_vm3, %v2632_v51, -1e+30  ;;  %v3978_v53 = vpop.f32.mrb[25].mxu0  ;;  %v4421_v51 = vld [vmem:[#allocation8 + $0x4] ss:$12 sps:$4 sm:$0xff]  }
 0x361   : > { %v2635_v55 = vpop.f32.mrb[26].mxu0  ;;  %v2639_v56 = vsel %vm2058_vm4, %v2638_v52, -inf  ;;  %3218 = vmatprep.subr.bf16.mxu0 %v4421_v51  ;;  %v4422_v53 = vld [vmem:[#allocation8 + $0x18] ss:$12 sps:$4 sm:$0xff]  }
 0x362   : > { %2640 = vmax.xlane.f32.xlu0 %v2639_v56  ;;  %v3979_v57 = vpop.f32.mrb[27].mxu0  ;;  %3219 = vmatpush1.bf16.msra.mxu0 %v4419_v50  ;;  %v4427_v56 = vld [vmem:[#allocation8 + $0x34] ss:$12 sps:$4 sm:$0xff]   ;;  %v4476_v51 = vld [vmem:[#allocation8 + $0x158] ss:$12 sps:$4 sm:$0xff]  }
 0x363   : > { %v4446_v57 = vld [vmem:[#allocation8 + $0xc8] ss:$12 sps:$4 sm:$0xff]  }
 0x36c   : > { %v2296_v58 = vpop.xlane.xlu0 %2295 }
 0x36d   : > { %v2297_v17 = vsub.f32 %v5019_v31, %v2296_v58  ;;  %v2308_v31 = vsel %vm2072_vm2, %v2246_v13, 0  ;;  %v4447_v58 = vld [vmem:[#allocation8 + $0x8] ss:$12 sps:$4 sm:$0xff]  }
 0x36f   : > { %v2298_v22 = vmul.f32 1.442695, %v2297_v17  ;;  %v4443_v17 = vld [vmem:[#allocation8 + $0xc0] ss:$12 sps:$4 sm:$0xff]  }
 0x370   : > { %v2186_v59 = vpop.permute.xlu0 %2185 }
 0x371   : > { %v2191_v60 = vsel %vm2072_vm2, %v2186_v59, 0  ;;  %v4425_v59 = vld [vmem:[#allocation8 + $0x30] ss:$12 sps:$4 sm:$0xff]  }
 0x372   : > { %3933 = vmatpush3.bf16.msra.mxu1 %v2191_v60 }
 0x373   : > { %3944 = vmatprep.subr.bf16.mxu1 %v4708_v18 }
 0x3ef   : > { %v2641_v19 = vpop.xlane.xlu0 %2640 }
 0x3f0   : > { %v2642_v23 = vsub.f32 %v2638_v52, %v2641_v19  ;;  %v4424_v52 = vld [vmem:[#allocation8 + $0x1c] ss:$12 sps:$4 sm:$0xff]  }
 0x3f1   : > { %3220 = vmatprep.subr.bf16.mxu0 %v4424_v52  ;;  %v4450_v19 = vld [vmem:[#allocation8 + $0xdc] ss:$12 sps:$4 sm:$0xff]   ;;  %v4477_v52 = vld [vmem:[#allocation8 + $0x98] ss:$12 sps:$4 sm:$0xff]  }
 0x3f2   : > { %v5042_v61 = vpop.f32.mrb[16].mxu1  ;;  %v2643_v54 = vmul.f32 1.442695, %v2642_v23  ;;  %3221 = vmatpush1.bf16.msra.mxu0 %v4422_v53  ;;  %v4453_v23 = vld [vmem:[#allocation8 + $0xf0] ss:$12 sps:$4 sm:$0xff]  }
 0x3f3   : > { %v3924_v62 = vpop.f32.mrb[17].mxu1  ;;  %3222 = vmatprep.subr.bf16.mxu0 %v4427_v56  ;;  %v4480_v56 = vld [vmem:[#allocation8 + $0x16c] ss:$12 sps:$4 sm:$0xff]  }
 0x3f4   : > { %v2113_v63 = vpop.f32.mrb[18].mxu1  ;;  %v4430_v62 = vld [vmem:[#allocation8 + $0x4c] ss:$12 sps:$4 sm:$0xff]  }
 0x3f5   : > { %v3925_v0 = vpop.f32.mrb[19].mxu1  ;;  %v4428_v63 = vld [vmem:[#allocation8 + $0x48] ss:$12 sps:$4 sm:$0xff]  }
 0x3f6   : > { %3223 = vmatpush1.bf16.msra.mxu0 %v4425_v59  ;;  %v4481_v59 = vld [vmem:[#allocation8 + $0x170] ss:$12 sps:$4 sm:$0xff]  }
 0x3f7   : > { %3224 = vmatprep.subr.bf16.mxu0 %v4430_v62  ;;  %v4482_v62 = vld [vmem:[#allocation8 + $0xb0] ss:$12 sps:$4 sm:$0xff]  }
 0x3fa   : > { %v2167_v1 = vpop.f32.mrb[20].mxu1  ;;  %3225 = vmatpush1.bf16.msra.mxu0 %v4428_v63 }
 0x3fb   : > { %v2173_v2 = vsel %vm4999_vm3, %v2167_v1, -1e+30  ;;  %v3930_v3 = vpop.f32.mrb[21].mxu1  ;;  %v4433_v1 = vld [vmem:[#allocation8 + $0x64] ss:$12 sps:$4 sm:$0xff]  }
 0x3fc   : > { %v2170_v4 = vpop.f32.mrb[22].mxu1  ;;  %v2174_v6 = vsel %vm2058_vm4, %v2173_v2, -inf  ;;  %3226 = vmatprep.subr.bf16.mxu0 %v4433_v1  ;;  %v4436_v3 = vld [vmem:[#allocation8 + $0x7c] ss:$12 sps:$4 sm:$0xff]  }
 0x3fd   : > { %v3931_v8 = vpop.f32.mrb[23].mxu1  ;;  %2175 = vmax.xlane.f32.xlu1 %v2174_v6  ;;  %v4434_v4 = vld [vmem:[#allocation8 + $0x78] ss:$12 sps:$4 sm:$0xff]   ;;  %v4439_v6 = vld [vmem:[#allocation8 + $0x94] ss:$12 sps:$4 sm:$0xff]  }
 0x3fe   : > { %v4437_v8 = vld [vmem:[#allocation8 + $0x90] ss:$12 sps:$4 sm:$0xff]  }
 0x401   : > { %2408 = vmax.xlane.f32.xlu1 %v2407_v10 }
 0x405   : > { %2527 = vmax.xlane.f32.xlu1 %v2526_v12 }
 0x416   : > { %2418 = vrot.lane.b32.xlu1 %v2246_v13, %s4710_s21  ;;  %v4440_v13 = vld [vmem:[#allocation8 + $0xa8] ss:$12 sps:$4 sm:$0xff]  }
 0x41a   : > { %2650 = vrot.lane.b32.xlu1 %v2478_v15, %s4710_s21  ;;  %v4445_v15 = vld [vmem:[#allocation8 + $0xc4] ss:$12 sps:$4 sm:$0xff]  }
 0x48a   : > { %v2176_v20 = vpop.xlane.xlu1 %2175 }
 0x48b   : > { %v2177_v21 = vsub.f32 %v2173_v2, %v2176_v20  ;;  %v4431_v2 = vld [vmem:[#allocation8 + $0x60] ss:$12 sps:$4 sm:$0xff]   ;;  %v4448_v20 = vld [vmem:[#allocation8 + $0xd8] ss:$12 sps:$4 sm:$0xff]  }
 0x48c   : > { %3227 = vmatpush1.bf16.msra.mxu0 %v4431_v2 }
 0x48d   : > { %v2178_v24 = vmul.f32 1.442695, %v2177_v21  ;;  %3228 = vmatprep.subr.bf16.mxu0 %v4436_v3 }
 0x48e   : > { %v2409_v25 = vpop.xlane.xlu1 %2408 }
 0x48f   : > { %4520 = vpow2.f32 %v2178_v24  ;;  %v2410_v26 = vsub.f32 %v2406_v7, %v2409_v25  ;;  %v4455_v24 = vld [vmem:[#allocation8 + $0xf4] ss:$12 sps:$4 sm:$0xff]   ;;  %v4456_v25 = vld [vmem:[#allocation8 + $0xf8] ss:$12 sps:$4 sm:$0xff]  }
 0x490   : > { %4522 = vpow2.f32 %v2298_v22  ;;  %3229 = vmatpush1.bf16.msra.mxu0 %v4434_v4  ;;  %v4452_v22 = vld [vmem:[#allocation8 + $0x20] ss:$12 sps:$4 sm:$0xff]  }
 0x491   : > { %v2411_v27 = vmul.f32 1.442695, %v2410_v26  ;;  %3230 = vmatprep.subr.bf16.mxu0 %v4439_v6  ;;  %v4457_v26 = vld [vmem:[#allocation8 + $0x38] ss:$12 sps:$4 sm:$0xff]  }
 0x492   : > { %v2528_v9 = vpop.xlane.xlu1 %2527 }
 0x493   : > { %4524 = vpow2.f32 %v2411_v27  ;;  %v2529_v33 = vsub.f32 %v2525_v11, %v2528_v9  ;;  %v4442_v11 = vld [vmem:[#allocation8 + $0xac] ss:$12 sps:$4 sm:$0xff]   ;;  %v4461_v27 = vld [vmem:[#allocation8 + $0x110] ss:$12 sps:$4 sm:$0xff]   ;;  %v4458_v9 = vld [vmem:[#allocation8 + $0x108] ss:$12 sps:$4 sm:$0xff]  }
 0x494   : > { %4526 = vpow2.f32 %v2643_v54  ;;  %3231 = vmatpush1.bf16.msra.mxu0 %v4437_v8  ;;  %v4460_v54 = vld [vmem:[#allocation8 + $0x10c] ss:$12 sps:$4 sm:$0xff]  }
 0x495   : > { %v2530_v37 = vmul.f32 1.442695, %v2529_v33  ;;  %3232 = vmatprep.subr.bf16.mxu0 %v4442_v11 }
 0x496   : > { %v2419_v38 = vpop.permute.xlu1 %2418 }
 0x497   : > { %v2424_v43 = vsel %vm2072_vm2, %v2419_v38, 0  ;;  %4528 = vpow2.f32 %v2530_v37  ;;  %v4467_v37 = vld [vmem:[#allocation8 + $0x68] ss:$12 sps:$4 sm:$0xff]  }
 0x498   : > { %3233 = vmatpush1.bf16.msra.mxu0 %v4440_v13 }
 0x499   : > { %v4521_v48 = vpop.eup %4520  ;;  %3234 = vmatprep.subr.bf16.mxu0 %v4445_v15 }
 0x49a   : > { %v2180_v28 = vsel %vm2058_vm4, %v4521_v48, 0.0  ;;  %v2183_v29 = vpack.c.bf16 %v4521_v48, %v4521_v48  ;;  %v4523_v30 = vpop.eup %4522  ;;  %v2651_v5 = vpop.permute.xlu1 %2650 }
 0x49b   : > { %2181 = vadd.xlane.f32.xlu1 %v2180_v28  ;;  %v2300_v35 = vsel %vm2058_vm4, %v4523_v30, 0.0  ;;  %v2303_v42 = vpack.c.bf16 %v4523_v30, %v4523_v30  ;;  %v2656_v40 = vsel %vm2072_vm2, %v2651_v5, 0  ;;  %v4465_v28 = vld [vmem:[#allocation8 + $0x124] ss:$12 sps:$4 sm:$0xff]   ;;  %v4466_v30 = vld [vmem:[#allocation8 + $0x128] ss:$12 sps:$4 sm:$0xff]  }
 0x49c   : > { %3935 = vmatmul.mubr.msk.bf16.vlgmr.msra.gmra.mrb[24].mxu1 %vm2058_vm4, %v2183_v29  ;;  %3235 = vmatpush1.bf16.msra.mxu0 %v4443_v17  ;;  %v4462_v29 = vld [vmem:[#allocation8 + $0x50] ss:$12 sps:$4 sm:$0xff]  }
 0x49d   : > { %v4525_v32 = vpop.eup %4524  ;;  %3945 = vmatpush3.bf16.msra.mxu1 %v2308_v31  ;;  %3946 = vmatprep.mubr.msk.bf16.mxu1 %vm4709_vm0, %v4708_v18  ;;  %v4463_v31 = vld [vmem:[#allocation8 + $0x120] ss:$12 sps:$4 sm:$0xff]  }
 0x49e   : > { %v2413_v34 = vsel %vm2058_vm4, %v4525_v32, 0.0  ;;  %3956 = vmatprep.subr.bf16.mxu1 %v4708_v18  ;;  %v4527_v36 = vpop.eup %4526  ;;  %v2416_v45 = vpack.c.bf16 %v4525_v32, %v4525_v32  ;;  %3236 = vmatprep.subr.bf16.mxu0 %v4450_v19 }
 0x49f   : > { %2414 = vadd.xlane.f32.xlu0 %v2413_v34  ;;  %2301 = vadd.xlane.f32.xlu1 %v2300_v35  ;;  %v2645_v41 = vsel %vm2058_vm4, %v4527_v36, 0.0  ;;  %v2648_v49 = vpack.c.bf16 %v4527_v36, %v4527_v36  ;;  %v4470_v34 = vld [vmem:[#allocation8 + $0x13c] ss:$12 sps:$4 sm:$0xff]  }
 0x4a0   : > { %3237 = vmatpush1.bf16.msra.mxu0 %v4448_v20 }
 0x4a1   : > { %v5081_v47 = vpop.eup %4528  ;;  %3238 = vmatprep.subr.bf16.mxu0 %v4455_v24 }
 0x4a2   : > { %v2535_v39 = vpack.c.bf16 %v5081_v47, %v5081_v47 }
 0x4a3   : > { %2646 = vadd.xlane.f32.xlu0 %v2645_v41 }
 0x4a4   : > { %3947 = vmatmul.mubr.msk.bf16.vlgmr.msra.gmra.mrb[28].mxu1 %vm2058_vm4, %v2303_v42  ;;  %3239 = vmatpush1.bf16.msra.mxu0 %v4453_v23 }
 0x4a5   : > { %3957 = vmatpush3.bf16.msra.mxu1 %v2424_v43  ;;  %3958 = vmatprep.mubr.msk.bf16.mxu1 %vm4709_vm0, %v4708_v18  ;;  %v4468_v43 = vld [vmem:[#allocation8 + $0x138] ss:$12 sps:$4 sm:$0xff]  }
 0x4a6   : > { %3968 = vmatprep.subr.bf16.mxu1 %v4708_v18  ;;  %3240 = vmatprep.subr.bf16.mxu0 %v4460_v54  ;;  %v4485_v54 = vld [vmem:[#allocation8 + $0x180] ss:$12 sps:$4 sm:$0xff]  }
 0x4a7   : > { %2066 = vadd.xlane.f32.xlu0 %v2065_v44  ;;  %v4471_v44 = vld [vmem:[#allocation8 + $0x140] ss:$12 sps:$4 sm:$0xff]  }
 0x4a8   : > { %3241 = vmatpush1.bf16.msra.mxu0 %v4458_v9  ;;  %v4492_v9 = vld [vmem:[#allocation8 + $0x1a0] ss:$12 sps:$4 sm:$0xff]  }
 0x4a9   : > { %3242 = vmatprep.subr.bf16.mxu0 %v4465_v28  ;;  %v4495_v28 = vld [vmem:[#allocation8 + $0x1b4] ss:$12 sps:$4 sm:$0xff]  }
 0x4ac   : > { %3959 = vmatmul.mubr.msk.bf16.vlgmr.msra.gmra.mrb[32].mxu1 %vm2058_vm4, %v2416_v45  ;;  %3243 = vmatpush1.bf16.msra.mxu0 %v4463_v31  ;;  %v4472_v45 = vld [vmem:[#allocation8 + $0x80] ss:$12 sps:$4 sm:$0xff]  }
 0x4ad   : > { %3969 = vmatpush3.bf16.msra.mxu1 %v2540_v46  ;;  %3970 = vmatprep.mubr.msk.bf16.mxu1 %vm4709_vm0, %v4708_v18  ;;  %v4499_v31 = vld [vmem:[#allocation8 + $0x1cc] ss:$12 sps:$4 sm:$0xff]  }
 0x4ae   : > { %3980 = vmatprep.subr.bf16.mxu1 %v4708_v18  ;;  %3244 = vmatprep.subr.bf16.mxu0 %v4470_v34  ;;  %v4503_v34 = vld [vmem:[#allocation8 + $0x1e4] ss:$12 sps:$4 sm:$0xff]  }
 0x4b0   : > { %3245 = vmatpush1.bf16.msra.mxu0 %v4468_v43  ;;  %v4512_v43 = vld [vmem:[#allocation8 + $0x218] ss:$12 sps:$4 sm:$0xff]  }
 0x4b4   : > { %3971 = vmatmul.mubr.msk.bf16.vlgmr.msra.gmra.mrb[36].mxu1 %vm2058_vm4, %v2535_v39  ;;  %v4473_v39 = vld [vmem:[#allocation8 + $0x150] ss:$12 sps:$4 sm:$0xff]  }
 0x4b5   : > { %3981 = vmatpush3.bf16.msra.mxu1 %v2656_v40  ;;  %3982 = vmatprep.mubr.msk.bf16.mxu1 %vm4709_vm0, %v4708_v18  ;;  %v4475_v40 = vld [vmem:[#allocation8 + $0x154] ss:$12 sps:$4 sm:$0xff]  }
 0x4b6   : > { %3863 = vmatprep.subr.bf16.mxu1 %v4446_v57  ;;  %3246 = vmatprep.subr.bf16.mxu0 %v4475_v40 }
 0x4b7   : > { %3247 = vmatpush1.bf16.msra.mxu0 %v4473_v39 }
 0x4b8   : > { %3248 = vmatprep.subr.bf16.mxu0 %v4480_v56 }
 0x4bc   : > { %3983 = vmatmul.mubr.msk.bf16.vlgmr.msra.gmra.mrb[40].mxu1 %vm2058_vm4, %v2648_v49 }
 0x4bd   : > { %3864 = vmatpush3.bf16.msra.mxu1 %v4447_v58 }
 0x528   : > { %v2182_v21 = vpop.xlane.xlu1 %2181 }
 0x52c   : > { %v5090_v55 = vpop.xlane.xlu0 %2414  ;;  %v2302_v48 = vpop.xlane.xlu1 %2301 }
 0x530   : > { %v5092_v60 = vpop.xlane.xlu0 %2646 }
 0x534   : > { %v2067_v0 = vpop.xlane.xlu0 %2066 }
 0x535   : > { %4530 = vrcp.f32 %v2067_v0 }
 0x536   : > { %4532 = vrcp.f32 %v2182_v21 }
 0x537   : > { %4534 = vrcp.f32 %v2302_v48  ;;  %v4491_v48 = vld [vmem:[#allocation8 + $0x19c] ss:$12 sps:$4 sm:$0xff]  }
 0x538   : > { %4536 = vrcp.f32 %v5090_v55  ;;  %v4478_v55 = vld [vmem:[#allocation8 + $0x168] ss:$12 sps:$4 sm:$0xff]  }
 0x539   : > { %3249 = vmatpush1.bf16.msra.mxu0 %v4478_v55  ;;  %4538 = vrcp.f32 %v5092_v60  ;;  %v2806_v55 = vld [vmem:[%s5181_s3] sm:$0x7] }
 0x53f   : > { %v4531_v7 = vpop.eup %4530 }
 0x540   : > { %v2117_v10 = vmul.f32 %v4531_v7, %v5042_v61  ;;  %v4451_v61 = vld [vmem:[#allocation8 + $0xe0] ss:$12 sps:$4 sm:$0xff]   ;;  %v4533_v32 = vpop.eup %4532  ;;  %v4487_v7 = vld [vmem:[#allocation8 + $0x184] ss:$12 sps:$4 sm:$0xff]  }
 0x541   : > { %3865 = vmatprep.subr.bf16.mxu1 %v4451_v61  ;;  %v4535_v46 = vpop.eup %4534  ;;  %3259 = vmatprep.subr.bf16.mxu0 %v4487_v7 }
 0x542   : > { %v2118_v12 = vpack.c.bf16 %v2117_v10, %v2117_v10  ;;  %3866 = vmatpush3.bf16.msra.mxu1 %v4452_v22  ;;  %v4537_v63 = vpop.eup %4536  ;;  %v2532_v22 = vsel %vm2058_vm4, %v5081_v47, 0.0  ;;  %v4489_v47 = vld [vmem:[#allocation8 + $0x198] ss:$12 sps:$4 sm:$0xff]  }
 0x543   : > { %3867 = vmatprep.subr.bf16.mxu1 %v4456_v25  ;;  %v4539_v13 = vpop.eup %4538 }
 0x544   : > { %2120 = vst.msk [vmem:[#allocation2] sm:$0xf] %vm2119_vm5, %v2118_v12 }
 0x546   : > { %3868 = vmatpush3.bf16.msra.mxu1 %v4457_v26 }
 0x547   : > { %3869 = vmatprep.subr.bf16.mxu1 %v4461_v27  ;;  %v4488_v27 = vld [vmem:[#allocation8 + $0x188] ss:$12 sps:$4 sm:$0xff]  }
 0x54a   : > { %3870 = vmatpush3.bf16.msra.mxu1 %v4462_v29  ;;  %v4493_v29 = vld [vmem:[#allocation8 + $0x1b0] ss:$12 sps:$4 sm:$0xff]  }
 0x54b   : > { %3871 = vmatprep.subr.bf16.mxu1 %v4466_v30  ;;  %v4496_v30 = vld [vmem:[#allocation8 + $0x1b8] ss:$12 sps:$4 sm:$0xff]  }
 0x54e   : > { %3872 = vmatpush3.bf16.msra.mxu1 %v4467_v37  ;;  %v4505_v37 = vld [vmem:[#allocation8 + $0x1f8] ss:$12 sps:$4 sm:$0xff]  }
 0x54f   : > { %3873 = vmatprep.subr.bf16.mxu1 %v4471_v44  ;;  %v4515_v44 = vld [vmem:[#allocation8 + $0x22c] ss:$12 sps:$4 sm:$0xff]  }
 0x552   : > { %3874 = vmatpush3.bf16.msra.mxu1 %v4472_v45  ;;  %v4513_v45 = vld [vmem:[#allocation8 + $0x228] ss:$12 sps:$4 sm:$0xff]  }
 0x553   : > { %3875 = vmatprep.subr.bf16.mxu1 %v4476_v51 }
 0x556   : > { %3876 = vmatpush3.bf16.msra.mxu1 %v4477_v52 }
 0x557   : > { %3877 = vmatprep.subr.bf16.mxu1 %v4481_v59  ;;  %v2810_v59 = vsub.s32 0, %v4995_v16 }
 0x55a   : > { %3878 = vmatpush3.bf16.msra.mxu1 %v4482_v62  ;;  %v2814_v62 = vsub.s32 1, %v4995_v16 }
 0x55b   : > { %3986 = vmatprep.subr.bf16.mxu1 %v4708_v18 }
 0x56f   : > { %v2227_v33 = vpop.f32.mrb[24].mxu1 }
 0x570   : > { %v2234_v35 = vmul.f32 %v4533_v32, %v2227_v33  ;;  %v3936_v36 = vpop.f32.mrb[25].mxu1  ;;  %v4497_v32 = vld [vmem:[#allocation8 + $0x1c8] ss:$12 sps:$4 sm:$0xff]   ;;  %v4500_v33 = vld [vmem:[#allocation8 + $0x1d0] ss:$12 sps:$4 sm:$0xff]  }
 0x571   : > { %v2230_v38 = vpop.f32.mrb[26].mxu1  ;;  %v4507_v36 = vld [vmem:[#allocation8 + $0x1fc] ss:$12 sps:$4 sm:$0xff]  }
 0x572   : > { %v3805_v41 = vpack.c.bf16 %v2234_v35, %v2234_v35  ;;  %v3937_v42 = vpop.f32.mrb[27].mxu1  ;;  %v4504_v35 = vld [vmem:[#allocation8 + $0x1e8] ss:$12 sps:$4 sm:$0xff]   ;;  %v4508_v38 = vld [vmem:[#allocation8 + $0x200] ss:$12 sps:$4 sm:$0xff]  }
 0x573   : > { %v4509_v42 = vld [vmem:[#allocation8 + $0x210] ss:$12 sps:$4 sm:$0xff]  }
 0x574   : > { %2239 = vrot.lane.b32.xlu0 %v3805_v41, %s4710_s21  ;;  %v4511_v41 = vld [vmem:[#allocation8 + $0x214] ss:$12 sps:$4 sm:$0xff]  }
 0x577   : > { %v2344_v5 = vpop.f32.mrb[28].mxu1 }
 0x578   : > { %v2351_v49 = vmul.f32 %v4535_v46, %v2344_v5  ;;  %v3948_v50 = vpop.f32.mrb[29].mxu1  ;;  %v4516_v46 = vld [vmem:[#allocation8 + $0x230] ss:$12 sps:$4 sm:$0xff]  }
 0x579   : > { %v2347_v53 = vpop.f32.mrb[30].mxu1 }
 0x57a   : > { %v2352_v57 = vpack.c.bf16 %v2351_v49, %v2351_v49  ;;  %v3949_v58 = vpop.f32.mrb[31].mxu1 }
 0x57b   : > { %v2818_v58 = vsub.s32 2, %v4995_v16 }
 0x57c   : > { %2353 = vst.msk [vmem:[#allocation2 + $0x4] sm:$0xf] %vm2119_vm5, %v2352_v57 }
 0x57f   : > { %v2460_v0 = vpop.f32.mrb[32].mxu1 }
 0x580   : > { %v2467_v1 = vmul.f32 %v4537_v63, %v2460_v0  ;;  %v3960_v2 = vpop.f32.mrb[33].mxu1  ;;  %v2819_v63 = vrot.slane %v2806_v55, %v2818_v58  ;;  %v2811_v0 = vrot.slane %v2806_v55, %v2810_v59 }
 0x581   : > { %v2463_v3 = vpop.f32.mrb[34].mxu1 }
 0x582   : > { %v3806_v4 = vpack.c.bf16 %v2467_v1, %v2467_v1  ;;  %v3961_v6 = vpop.f32.mrb[35].mxu1  ;;  %v2815_v1 = vrot.slane %v2806_v55, %v2814_v62 }
 0x584   : > { %2472 = vrot.lane.b32.xlu1 %v3806_v4, %s4710_s21 }
 0x587   : > { %v5102_v8 = vpop.f32.mrb[36].mxu1 }
 0x588   : > { %v3972_v10 = vpop.f32.mrb[37].mxu1 }
 0x589   : > { %v2579_v11 = vpop.f32.mrb[38].mxu1 }
 0x58a   : > { %v3973_v12 = vpop.f32.mrb[39].mxu1 }
 0x58f   : > { %v2692_v15 = vpop.f32.mrb[40].mxu1 }
 0x590   : > { %v2699_v17 = vmul.f32 %v4539_v13, %v2692_v15  ;;  %v3984_v19 = vpop.f32.mrb[41].mxu1 }
 0x591   : > { %v2695_v20 = vpop.f32.mrb[42].mxu1 }
 0x592   : > { %v3807_v21 = vpack.c.bf16 %v2699_v17, %v2699_v17  ;;  %v3985_v61 = vpop.f32.mrb[43].mxu1 }
 0x594   : > { %2704 = vrot.lane.b32.xlu0 %v3807_v21, %s4710_s21 }
 0x5a8   : > { %2533 = vadd.xlane.f32.xlu1 %v2532_v22 }
 0x5e6   : > { %v2240_v60 = vpop.permute.xlu0 %2239 }
 0x5e7   : > { %2243 = vst.msk [vmem:[#allocation2] sm:$0xf] %vm2242_vm6, %v2240_v60 }
 0x5f6   : > { %v2473_v23 = vpop.permute.xlu1 %2472 }
 0x5f7   : > { %2475 = vst.msk [vmem:[#allocation2 + $0x4] sm:$0xf] %vm2242_vm6, %v2473_v23 }
 0x5fe   : > { %v2708_v24 = vld [vmem:[#allocation2] sm:$0xff] }
 0x5ff   : > { %v3727_v25 = vcombine.low %v2708_v24, %v2708_v24  ;;  %v3728_v26 = vcombine.high %v2708_v24, %v2708_v24 }
 0x601   : > { %3250 = vmatprep.mubr.bf16.mxu0 %v3728_v26  ;;  %3332 = vmatprep.mubr.bf16.mxu1 %v3728_v26 }
 0x602   : > { %3251 = vmatmul.mubr.bf16.vlgmr.msra.gmra.mrb[28].mxu0 %v3727_v25  ;;  %3333 = vmatmul.mubr.bf16.vlgmr.msra.gmra.mrb[44].mxu1 %v3727_v25 }
 0x603   : > { %3260 = vmatpush1.bf16.msra.mxu0 %v4485_v54  ;;  %3987 = vmatpush3.bf16.msra.mxu1 %v4488_v27 }
 0x604   : > { %3261 = vmatprep.subr.bf16.mxu0 %v4491_v48  ;;  %3988 = vmatprep.subr.bf16.mxu1 %v4708_v18 }
 0x605   : > { %3291 = vmatprep.mubr.bf16.mxu0 %v4707_v14  ;;  %4002 = vmatprep.mubr.msk.bf16.mxu1 %vm4709_vm0, %v4708_v18  ;;  %v4501_v14 = vld [vmem:[#allocation8 + $0x1e0] ss:$12 sps:$4 sm:$0xff]  }
 0x606   : > { %v2705_v50 = vpop.permute.xlu0 %2704 }
 0x607   : > { %3262 = vmatpush1.bf16.msra.mxu0 %v4489_v47  ;;  %3989 = vmatpush3.bf16.msra.mxu1 %v4492_v9 }
 0x608   : > { %3263 = vmatprep.subr.bf16.mxu0 %v4495_v28  ;;  %3990 = vmatprep.subr.bf16.mxu1 %v4708_v18 }
 0x60b   : > { %3264 = vmatpush1.bf16.msra.mxu0 %v4493_v29  ;;  %3991 = vmatpush3.bf16.msra.mxu1 %v4496_v30 }
 0x60c   : > { %3265 = vmatprep.subr.bf16.mxu0 %v4499_v31  ;;  %3992 = vmatprep.subr.bf16.mxu1 %v4708_v18 }
 0x60f   : > { %3266 = vmatpush1.bf16.msra.mxu0 %v4497_v32  ;;  %3993 = vmatpush3.bf16.msra.mxu1 %v4500_v33 }
 0x610   : > { %3267 = vmatprep.subr.bf16.mxu0 %v4503_v34  ;;  %3994 = vmatprep.subr.bf16.mxu1 %v4708_v18 }
 0x613   : > { %3268 = vmatpush1.bf16.msra.mxu0 %v4501_v14  ;;  %3995 = vmatpush3.bf16.msra.mxu1 %v4504_v35 }
 0x614   : > { %3269 = vmatprep.subr.bf16.mxu0 %v4507_v36  ;;  %3996 = vmatprep.subr.bf16.mxu1 %v4708_v18 }
 0x617   : > { %3270 = vmatpush1.bf16.msra.mxu0 %v4505_v37  ;;  %3997 = vmatpush3.bf16.msra.mxu1 %v4508_v38 }
 0x618   : > { %3271 = vmatprep.subr.bf16.mxu0 %v4511_v41  ;;  %3998 = vmatprep.subr.bf16.mxu1 %v4708_v18 }
 0x61b   : > { %3272 = vmatpush1.bf16.msra.mxu0 %v4509_v42  ;;  %3999 = vmatpush3.bf16.msra.mxu1 %v4512_v43 }
 0x61c   : > { %3273 = vmatprep.subr.bf16.mxu0 %v4515_v44  ;;  %4000 = vmatprep.subr.bf16.mxu1 %v4708_v18 }
 0x61f   : > { %3274 = vmatpush1.bf16.msra.mxu0 %v4513_v45  ;;  %4001 = vmatpush3.bf16.msra.mxu1 %v4516_v46 }
 0x635   : > { %v2534_v5 = vpop.xlane.xlu1 %2533 }
 0x636   : > { %4540 = vrcp.f32 %v2534_v5 }
 0x640   : > { %v4541_v39 = vpop.eup %4540 }
 0x641   : > { %v2583_v40 = vmul.f32 %v4541_v39, %v5102_v8 }
 0x643   : > { %v2584_v49 = vpack.c.bf16 %v2583_v40, %v2583_v40 }
 0x645   : > { %2585 = vst.msk [vmem:[#allocation2 + $0x8] sm:$0xf] %vm2119_vm5, %v2584_v49 }
 0x646   : > { %2707 = vst.msk [vmem:[#allocation2 + $0x8] sm:$0xf] %vm2242_vm6, %v2705_v50 }
 0x64d   : > { %v4517_v51 = vld [vmem:[#allocation2 + $0x8] ss:$0 sps:$4 sm:$0xff]  }
 0x64e   : > { %3292 = vmatmul.mubr.bf16.vlgmr.msra.gmra.mrb[28].mxu0 %v4517_v51  ;;  %4003 = vmatmul.mubr.bf16.vlgmr.msra.gmra.mrb[48].mxu1 %v4517_v51 }
 0x6d5   : > { %v3879_v52 = vpop.f32.mrb[44].mxu1 }
 0x6d6   : > { %v3880_v18 = vpop.f32.mrb[45].mxu1 }
 0x6d7   : > { %v3881_v53 = vadd.f32 %v3880_v18, %v3879_v52  ;;  %v3882_v56 = vpop.f32.mrb[46].mxu1 }
 0x6d8   : > { %v3883_v57 = vpop.f32.mrb[47].mxu1 }
 0x6d9   : > { %v3335_v2 = vadd.f32 %v3881_v53, %v2819_v63 }
 0x721   : > { %v3293_v3 = vpop.f32.mrb[28].mxu0  ;;  %v3374_v4 = vpop.f32.mrb[48].mxu1 }
 0x722   : > { %v4006_v6 = vadd.f32 %v3293_v3, %v2811_v0  ;;  %v3375_v7 = vadd.f32 %v3374_v4, %v3335_v2  ;;  %v3295_v8 = vpop.f32.mrb[29].mxu0  ;;  %v4004_v10 = vpop.f32.mrb[49].mxu1 }
 0x723   : > { %v4007_v11 = vadd.f32 %v3295_v8, %v2815_v1  ;;  %v3297_v12 = vpop.f32.mrb[30].mxu0  ;;  %v3377_v13 = vpop.f32.mrb[50].mxu1 }
 0x724   : > { %3380 = vst [vmem:[%s242_s25] sm:$0xff] %v4006_v6  ;;  %3382 = vst [vmem:[%s242_s25 + $0x10] sm:$0xff] %v3375_v7  ;;  %v3298_v16 = vpop.f32.mrb[31].mxu0  ;;  %v4005_v15 = vpop.f32.mrb[51].mxu1 }
 0x725   : > { %3381 = vst [vmem:[%s242_s25 + $0x8] sm:$0xff] %v4007_v11 }
 0x726   : > { %4641 = shalt.err (!%p4638_p2)
}
 0x727   : > { %s4642_s6 = scalar_lea.hbm %s5134_s28, 384  ;;  %s4646_s10 = scalar_lea.hbm %s5182_s4, 768 }
 0x728   : > { %p4643_p13 = scmp.ne.s32.totalorder %s5134_s28, %s4642_s6  ;;  %p4647_p4 = scmp.lt.u32.totalorder %s5134_s28, %s5182_s4 }
 0x729   : > { %p4648_p7 = scmp.lt.u32.totalorder %s4646_s10, %s4642_s6  ;;  %p4650_p11 = scmp.lt.u32.totalorder %s4642_s6, %s5134_s28 }
 0x72a   : > { %p4644_p6 = pnand %p4643_p13, %p5198_p0 }
 0x72b   : > { %p4649_p8 = por %p4648_p7, %p4647_p4 }
 0x72c   : > { %p4645_p10 = pneg %p4644_p6 }
 0x72d   : > { %p4651_p1 = por %p4650_p11, %p4649_p8 }
 0x72f   : > { %p4652_p3 = pnand %p4651_p1, %p4645_p10 }
 0x731   : > { %4655 = shalt.err (!%p4652_p3)
}
 0x732   : > { %4042 = dma.vmem_to_hbm [thread:$0]  (%p5198_p0), %s5136_s7, 384, %s5134_s28, %s3384_s19  }
 0x733 PF: > { %s3410_s27 = sand.u32 1, %s4686_s15   ;;  %p5199_p5 = scmp.ne.s32.totalorder %s5187_s22, 0 }
 0x734   : > { %p5200_p9 = scmp.ge.s32.totalorder %s4698_s18, 2  ;;  %s3411_s5 = scalar_lea.sflag [#allocation5], %s3410_s27 }
 0x736   : > { %p4056_p12 = pnand %p5200_p9, %p5199_p5 }
 0x738   : > { %4681 = dma.done.wait (!%p4056_p12), %s3411_s5, 384  }
 0x739   : > { %4683 = vsyncadd (!%p4056_p12), %s3411_s5, 4294966912  ;;  %p18_p2 = scmp.ge.s32.totalorder %s4847_s11, 4   ;;  %s5201_s15 = smov %s4690_s16 }
 0x73a   : > { %s5202_s16 = smov %s4694_s17  ;;  %s5203_s17 = smov %s4856_s14 }
 0x73b   : > { %s5204_s18 = smov %s4847_s11  ;;  %20 = sbr.rel (!%p18_p2) target bundleno = 6 (0x6), region = 89 }
 0x742   :  { %3416 = vsyncpa [#allocation4], 1 }
 0x743   :  { %3418 = vsyncpa [#allocation4 + $0x1], 1 }
 0x744   :  { %3419 = vsyncpa [#allocation7], 1 }
 0x745   :  { %3420 = vsyncpa [#allocation5], 1 }
 0x746   :  { %3422 = vsyncpa [#allocation5 + $0x1], 1 }

</bundles_post_ra>
